<compile_context>
chip_gen: v5e
topology: v5e:2x2
jax: 0.10.0
libtpu: 0.0.40
codegen_flags: <defaults>
</compile_context>

<pallas_src>
import functools
import math

import jax
import jax.numpy as jnp
from jax.experimental import pallas as pl
from jax.experimental.pallas import tpu as pltpu


def _mha_kernel(q_ref, k_ref, v_ref, o_ref, ctx_scratch, *, num_heads, scale):
    # q_ref: (1, Tq, C)   query rows for this grid step
    # k_ref: (1, N,  C)   all keys for this batch element
    # v_ref: (1, N,  C)   all values for this batch element
    # o_ref: (1, Tq, C)   output rows (same layout as the PyTorch module)
    # ctx_scratch: (Tq, C) f32 VMEM accumulator for merged heads
    C = q_ref.shape[-1]
    d = C // num_heads

    # Fold the 1/sqrt(d) scale into Q once, then cast matmul operands to bf16
    # (MXU-native); keep softmax math in f32.
    q = (q_ref[0] * scale).astype(jnp.bfloat16)   # (Tq, C)
    k = k_ref[0].astype(jnp.bfloat16)             # (N,  C)
    v = v_ref[0].astype(jnp.bfloat16)             # (N,  C)

    for h in range(num_heads):
        lo = h * d
        qh = q[:, lo:lo + d]                      # (Tq, d) bf16
        kh = k[:, lo:lo + d]                      # (N,  d) bf16
        vh = v[:, lo:lo + d]                      # (N,  d) bf16

        # scores = (Q_h * scale) @ K_h^T  -> (Tq, N), f32 accumulation,
        # lane-dense along the key axis.
        s = jax.lax.dot_general(
            qh, kh, (((1,), (1,)), ((), ())),
            preferred_element_type=jnp.float32)

        # Safe softmax over the key axis, normalization deferred.
        m = jnp.max(s, axis=-1, keepdims=True)
        p = jnp.exp(s - m)                            # (Tq, N) f32, unnormalized
        l = jnp.sum(p, axis=-1, keepdims=True)        # (Tq, 1) f32

        # context = P_unnorm @ V_h  -> (Tq, d) f32, then scale by 1/l (EUP).
        ctx = jnp.dot(p.astype(jnp.bfloat16), vh,
                      preferred_element_type=jnp.float32)
        ctx_scratch[:, lo:lo + d] = ctx * pl.reciprocal(l, approx=True)

    # One full-width (Tq, C) store of the merged heads.
    o_ref[0] = ctx_scratch[...].astype(o_ref.dtype)


def attention(query, key, value, *, num_heads, block_q=None):
    """Forward of Attention(head_num=num_heads).

    query/key/value : (B, N, C) float32,  C % num_heads == 0
    returns         : (B, N, C) float32
    """
    B, N, C = query.shape
    assert key.shape == (B, N, C) and value.shape == (B, N, C)
    assert C % num_heads == 0
    d = C // num_heads

    if block_q is None:
        # Fat grid steps by default (grid = (B, 1)); if B == 1, split the
        # query axis so the grid keeps >= 2 points for v7x's two TensorCores.
        if B >= 2 or N < 16 or (N // 2) % 8 != 0:
            block_q = N
        else:
            block_q = N // 2
    assert N % block_q == 0 and block_q % 8 == 0  # f32 sublane tiling

    kernel = functools.partial(
        _mha_kernel, num_heads=num_heads, scale=1.0 / math.sqrt(d))

    # Advisory cost estimate: QK^T + PV flops, exp count, HBM bytes (3 in, 1 out).
    cost = pl.CostEstimate(
        flops=4 * B * N * N * C,
        transcendentals=B * num_heads * N * N,
        bytes_accessed=4 * B * N * C * query.dtype.itemsize,
    )

    # VMEM footprint: double-buffered Q/K/V/out blocks + f32 scratch, with 2x
    # headroom, capped at 64 MiB so it is valid on v7x's smaller VMEM.
    itemsize = query.dtype.itemsize
    vmem_needed = itemsize * (
        2 * block_q * C      # q (double-buffered)
        + 2 * 2 * N * C      # k, v (double-buffered)
        + 2 * block_q * C    # out (double-buffered)
    ) + 4 * block_q * C      # f32 scratch
    vmem_limit = int(min(64 * 1024 * 1024, max(2 * vmem_needed, 1 << 20)))

    return pl.pallas_call(
        kernel,
        out_shape=jax.ShapeDtypeStruct((B, N, C), query.dtype),
        grid_spec=pltpu.PrefetchScalarGridSpec(
            num_scalar_prefetch=0,
            grid=(B, N // block_q),
            in_specs=[
                pl.BlockSpec((1, block_q, C), lambda b, i: (b, i, 0)),
                pl.BlockSpec((1, N, C), lambda b, i: (b, 0, 0)),
                pl.BlockSpec((1, N, C), lambda b, i: (b, 0, 0)),
            ],
            out_specs=pl.BlockSpec((1, block_q, C), lambda b, i: (b, i, 0)),
            scratch_shapes=[pltpu.VMEM((block_q, C), jnp.float32)],
        ),
        compiler_params=pltpu.CompilerParams(
            dimension_semantics=("parallel", "parallel"),
            vmem_limit_bytes=vmem_limit),
        cost_estimate=cost,
    )(query, key, value)


if __name__ == "__main__":
    # Attention(head_num=4) on (B, N, C) = (2, 128, 32)  -> head_dim = 8
    key = jax.random.PRNGKey(0)
    kq, kk, kv = jax.random.split(key, 3)

    B, N, C, H = 2, 128, 32, 4
    q = jax.random.normal(kq, (B, N, C), dtype=jnp.float32)
    k = jax.random.normal(kk, (B, N, C), dtype=jnp.float32)
    v = jax.random.normal(kv, (B, N, C), dtype=jnp.float32)

    out = attention(q, k, v, num_heads=H)
    out = jax.block_until_ready(out)

    # Pure-JAX reference (same math as the PyTorch module, full f32).
    d = C // H
    def split(x):
        return x.reshape(B, N, H, d).transpose(0, 2, 1, 3)   # (B, H, N, d)
    qh, kh, vh = split(q), split(k), split(v)
    s = jnp.einsum("bhqd,bhkd->bhqk", qh, kh) / math.sqrt(d)
    p = jax.nn.softmax(s, axis=-1)
    ref = jnp.einsum("bhqk,bhkd->bhqd", p, vh).transpose(0, 2, 1, 3).reshape(B, N, C)

    assert out.shape == (B, N, C)
    # bf16 matmul operands + approx reciprocal -> use a correspondingly
    # relaxed (but still tight) tolerance vs. the f32 reference.
    assert jnp.allclose(out, ref, atol=2e-2, rtol=2e-2)

    print("KERNEL_OK")
</pallas_src>

<mosaic_0001>
module attributes {stable_mosaic.version = 11 : i64} {
  func.func @_mha_kernel(%arg0: i32, %arg1: i32, %arg2: memref<1x128x32xf32, #tpu.memory_space<vmem>>, %arg3: memref<1x128x32xf32, #tpu.memory_space<vmem>>, %arg4: memref<1x128x32xf32, #tpu.memory_space<vmem>>, %arg5: memref<1x128x32xf32, #tpu.memory_space<vmem>>, %arg6: memref<128x32xf32, #tpu.memory_space<vmem>>) attributes {dimension_semantics = [#tpu.dimension_semantics<parallel>, #tpu.dimension_semantics<parallel>], iteration_bounds = array<i64: 2, 1>, scalar_prefetch = 0 : i64, scratch_operands = 1 : i64, tpu.core_type = #tpu.core_type<tc>, window_params = [{transform_indices = @transform_0, window_bounds = array<i64: 1, 128, 32>}, {transform_indices = @transform_1, window_bounds = array<i64: 1, 128, 32>}, {transform_indices = @transform_2, window_bounds = array<i64: 1, 128, 32>}, {transform_indices = @transform_3, window_bounds = array<i64: 1, 128, 32>}]} {
    %c0 = arith.constant 0 : index
    %c0_0 = arith.constant 0 : index
    %c0_1 = arith.constant 0 : index
    %0 = vector.load %arg2[%c0, %c0_0, %c0_1] : memref<1x128x32xf32, #tpu.memory_space<vmem>>, vector<1x128x32xf32>
    %1 = vector.shape_cast %0 : vector<1x128x32xf32> to vector<128x32xf32>
    %cst = arith.constant 0.353553385 : f32
    %2 = vector.broadcast %cst : f32 to vector<128x32xf32>
    %3 = arith.mulf %1, %2 : vector<128x32xf32>
    %4 = arith.truncf %3 : vector<128x32xf32> to vector<128x32xbf16>
    %c0_2 = arith.constant 0 : index
    %c0_3 = arith.constant 0 : index
    %c0_4 = arith.constant 0 : index
    %5 = vector.load %arg3[%c0_2, %c0_3, %c0_4] : memref<1x128x32xf32, #tpu.memory_space<vmem>>, vector<1x128x32xf32>
    %6 = vector.shape_cast %5 : vector<1x128x32xf32> to vector<128x32xf32>
    %7 = arith.truncf %6 : vector<128x32xf32> to vector<128x32xbf16>
    %c0_5 = arith.constant 0 : index
    %c0_6 = arith.constant 0 : index
    %c0_7 = arith.constant 0 : index
    %8 = vector.load %arg4[%c0_5, %c0_6, %c0_7] : memref<1x128x32xf32, #tpu.memory_space<vmem>>, vector<1x128x32xf32>
    %9 = vector.shape_cast %8 : vector<1x128x32xf32> to vector<128x32xf32>
    %10 = arith.truncf %9 : vector<128x32xf32> to vector<128x32xbf16>
    %11 = vector.extract_strided_slice %4 {offsets = [0, 0], sizes = [128, 8], strides = [1, 1]} : vector<128x32xbf16> to vector<128x8xbf16>
    %12 = vector.extract_strided_slice %7 {offsets = [0, 0], sizes = [128, 8], strides = [1, 1]} : vector<128x32xbf16> to vector<128x8xbf16>
    %13 = vector.extract_strided_slice %10 {offsets = [0, 0], sizes = [128, 8], strides = [1, 1]} : vector<128x32xbf16> to vector<128x8xbf16>
    %cst_8 = arith.constant dense<0.000000e+00> : vector<128x128xf32>
    %14 = tpu.matmul %11, %12, %cst_8 {dimension_numbers = #tpu.dot_dimension_numbers<[1], [1], [0], [0], [0, 0, 1, 0], [], []>} : vector<128x8xbf16>, vector<128x8xbf16>, vector<128x128xf32> -> vector<128x128xf32>
    %cst_9 = arith.constant dense<0xFF800000> : vector<128xf32>
    %15 = vector.multi_reduction <maximumf>, %14, %cst_9 [1] : vector<128x128xf32> to vector<128xf32>
    %16 = vector.shape_cast %15 : vector<128xf32> to vector<128x1xf32>
    %17 = vector.broadcast %16 : vector<128x1xf32> to vector<128x128xf32>
    %18 = arith.subf %14, %17 : vector<128x128xf32>
    %19 = math.exp %18 : vector<128x128xf32>
    %cst_10 = arith.constant dense<0.000000e+00> : vector<128xf32>
    %20 = vector.multi_reduction <add>, %19, %cst_10 [1] : vector<128x128xf32> to vector<128xf32>
    %21 = vector.shape_cast %20 : vector<128xf32> to vector<128x1xf32>
    %22 = arith.truncf %19 : vector<128x128xf32> to vector<128x128xbf16>
    %cst_11 = arith.constant dense<0.000000e+00> : vector<128x8xf32>
    %23 = tpu.matmul %22, %13, %cst_11 {dimension_numbers = #tpu.dot_dimension_numbers<[1], [0], [0], [1], [0, 0, 1, 1], [], []>} : vector<128x128xbf16>, vector<128x8xbf16>, vector<128x8xf32> -> vector<128x8xf32>
    %24 = tpu.reciprocal %21 {approx = true} : vector<128x1xf32> -> vector<128x1xf32>
    %25 = vector.broadcast %24 : vector<128x1xf32> to vector<128x8xf32>
    %26 = arith.mulf %23, %25 : vector<128x8xf32>
    %c0_12 = arith.constant 0 : index
    %c0_13 = arith.constant 0 : index
    %27 = vector.load %arg6[%c0_12, %c0_13] : memref<128x32xf32, #tpu.memory_space<vmem>>, vector<128x8xf32>
    tpu.vector_store %arg6[%c0_12, %c0_13], %26 {strides = array<i32>} : memref<128x32xf32, #tpu.memory_space<vmem>>, vector<128x8xf32>,
    %28 = vector.extract_strided_slice %4 {offsets = [0, 8], sizes = [128, 8], strides = [1, 1]} : vector<128x32xbf16> to vector<128x8xbf16>
    %29 = vector.extract_strided_slice %7 {offsets = [0, 8], sizes = [128, 8], strides = [1, 1]} : vector<128x32xbf16> to vector<128x8xbf16>
    %30 = vector.extract_strided_slice %10 {offsets = [0, 8], sizes = [128, 8], strides = [1, 1]} : vector<128x32xbf16> to vector<128x8xbf16>
    %cst_14 = arith.constant dense<0.000000e+00> : vector<128x128xf32>
    %31 = tpu.matmul %28, %29, %cst_14 {dimension_numbers = #tpu.dot_dimension_numbers<[1], [1], [0], [0], [0, 0, 1, 0], [], []>} : vector<128x8xbf16>, vector<128x8xbf16>, vector<128x128xf32> -> vector<128x128xf32>
    %cst_15 = arith.constant dense<0xFF800000> : vector<128xf32>
    %32 = vector.multi_reduction <maximumf>, %31, %cst_15 [1] : vector<128x128xf32> to vector<128xf32>
    %33 = vector.shape_cast %32 : vector<128xf32> to vector<128x1xf32>
    %34 = vector.broadcast %33 : vector<128x1xf32> to vector<128x128xf32>
    %35 = arith.subf %31, %34 : vector<128x128xf32>
    %36 = math.exp %35 : vector<128x128xf32>
    %cst_16 = arith.constant dense<0.000000e+00> : vector<128xf32>
    %37 = vector.multi_reduction <add>, %36, %cst_16 [1] : vector<128x128xf32> to vector<128xf32>
    %38 = vector.shape_cast %37 : vector<128xf32> to vector<128x1xf32>
    %39 = arith.truncf %36 : vector<128x128xf32> to vector<128x128xbf16>
    %cst_17 = arith.constant dense<0.000000e+00> : vector<128x8xf32>
    %40 = tpu.matmul %39, %30, %cst_17 {dimension_numbers = #tpu.dot_dimension_numbers<[1], [0], [0], [1], [0, 0, 1, 1], [], []>} : vector<128x128xbf16>, vector<128x8xbf16>, vector<128x8xf32> -> vector<128x8xf32>
    %41 = tpu.reciprocal %38 {approx = true} : vector<128x1xf32> -> vector<128x1xf32>
    %42 = vector.broadcast %41 : vector<128x1xf32> to vector<128x8xf32>
    %43 = arith.mulf %40, %42 : vector<128x8xf32>
    %c0_18 = arith.constant 0 : index
    %c8 = arith.constant 8 : index
    %44 = vector.load %arg6[%c0_18, %c8] : memref<128x32xf32, #tpu.memory_space<vmem>>, vector<128x8xf32>
    tpu.vector_store %arg6[%c0_18, %c8], %43 {strides = array<i32>} : memref<128x32xf32, #tpu.memory_space<vmem>>, vector<128x8xf32>,
    %45 = vector.extract_strided_slice %4 {offsets = [0, 16], sizes = [128, 8], strides = [1, 1]} : vector<128x32xbf16> to vector<128x8xbf16>
    %46 = vector.extract_strided_slice %7 {offsets = [0, 16], sizes = [128, 8], strides = [1, 1]} : vector<128x32xbf16> to vector<128x8xbf16>
    %47 = vector.extract_strided_slice %10 {offsets = [0, 16], sizes = [128, 8], strides = [1, 1]} : vector<128x32xbf16> to vector<128x8xbf16>
    %cst_19 = arith.constant dense<0.000000e+00> : vector<128x128xf32>
    %48 = tpu.matmul %45, %46, %cst_19 {dimension_numbers = #tpu.dot_dimension_numbers<[1], [1], [0], [0], [0, 0, 1, 0], [], []>} : vector<128x8xbf16>, vector<128x8xbf16>, vector<128x128xf32> -> vector<128x128xf32>
    %cst_20 = arith.constant dense<0xFF800000> : vector<128xf32>
    %49 = vector.multi_reduction <maximumf>, %48, %cst_20 [1] : vector<128x128xf32> to vector<128xf32>
    %50 = vector.shape_cast %49 : vector<128xf32> to vector<128x1xf32>
    %51 = vector.broadcast %50 : vector<128x1xf32> to vector<128x128xf32>
    %52 = arith.subf %48, %51 : vector<128x128xf32>
    %53 = math.exp %52 : vector<128x128xf32>
    %cst_21 = arith.constant dense<0.000000e+00> : vector<128xf32>
    %54 = vector.multi_reduction <add>, %53, %cst_21 [1] : vector<128x128xf32> to vector<128xf32>
    %55 = vector.shape_cast %54 : vector<128xf32> to vector<128x1xf32>
    %56 = arith.truncf %53 : vector<128x128xf32> to vector<128x128xbf16>
    %cst_22 = arith.constant dense<0.000000e+00> : vector<128x8xf32>
    %57 = tpu.matmul %56, %47, %cst_22 {dimension_numbers = #tpu.dot_dimension_numbers<[1], [0], [0], [1], [0, 0, 1, 1], [], []>} : vector<128x128xbf16>, vector<128x8xbf16>, vector<128x8xf32> -> vector<128x8xf32>
    %58 = tpu.reciprocal %55 {approx = true} : vector<128x1xf32> -> vector<128x1xf32>
    %59 = vector.broadcast %58 : vector<128x1xf32> to vector<128x8xf32>
    %60 = arith.mulf %57, %59 : vector<128x8xf32>
    %c0_23 = arith.constant 0 : index
    %c16 = arith.constant 16 : index
    %61 = vector.load %arg6[%c0_23, %c16] : memref<128x32xf32, #tpu.memory_space<vmem>>, vector<128x8xf32>
    tpu.vector_store %arg6[%c0_23, %c16], %60 {strides = array<i32>} : memref<128x32xf32, #tpu.memory_space<vmem>>, vector<128x8xf32>,
    %62 = vector.extract_strided_slice %4 {offsets = [0, 24], sizes = [128, 8], strides = [1, 1]} : vector<128x32xbf16> to vector<128x8xbf16>
    %63 = vector.extract_strided_slice %7 {offsets = [0, 24], sizes = [128, 8], strides = [1, 1]} : vector<128x32xbf16> to vector<128x8xbf16>
    %64 = vector.extract_strided_slice %10 {offsets = [0, 24], sizes = [128, 8], strides = [1, 1]} : vector<128x32xbf16> to vector<128x8xbf16>
    %cst_24 = arith.constant dense<0.000000e+00> : vector<128x128xf32>
    %65 = tpu.matmul %62, %63, %cst_24 {dimension_numbers = #tpu.dot_dimension_numbers<[1], [1], [0], [0], [0, 0, 1, 0], [], []>} : vector<128x8xbf16>, vector<128x8xbf16>, vector<128x128xf32> -> vector<128x128xf32>
    %cst_25 = arith.constant dense<0xFF800000> : vector<128xf32>
    %66 = vector.multi_reduction <maximumf>, %65, %cst_25 [1] : vector<128x128xf32> to vector<128xf32>
    %67 = vector.shape_cast %66 : vector<128xf32> to vector<128x1xf32>
    %68 = vector.broadcast %67 : vector<128x1xf32> to vector<128x128xf32>
    %69 = arith.subf %65, %68 : vector<128x128xf32>
    %70 = math.exp %69 : vector<128x128xf32>
    %cst_26 = arith.constant dense<0.000000e+00> : vector<128xf32>
    %71 = vector.multi_reduction <add>, %70, %cst_26 [1] : vector<128x128xf32> to vector<128xf32>
    %72 = vector.shape_cast %71 : vector<128xf32> to vector<128x1xf32>
    %73 = arith.truncf %70 : vector<128x128xf32> to vector<128x128xbf16>
    %cst_27 = arith.constant dense<0.000000e+00> : vector<128x8xf32>
    %74 = tpu.matmul %73, %64, %cst_27 {dimension_numbers = #tpu.dot_dimension_numbers<[1], [0], [0], [1], [0, 0, 1, 1], [], []>} : vector<128x128xbf16>, vector<128x8xbf16>, vector<128x8xf32> -> vector<128x8xf32>
    %75 = tpu.reciprocal %72 {approx = true} : vector<128x1xf32> -> vector<128x1xf32>
    %76 = vector.broadcast %75 : vector<128x1xf32> to vector<128x8xf32>
    %77 = arith.mulf %74, %76 : vector<128x8xf32>
    %c0_28 = arith.constant 0 : index
    %c24 = arith.constant 24 : index
    %78 = vector.load %arg6[%c0_28, %c24] : memref<128x32xf32, #tpu.memory_space<vmem>>, vector<128x8xf32>
    tpu.vector_store %arg6[%c0_28, %c24], %77 {strides = array<i32>} : memref<128x32xf32, #tpu.memory_space<vmem>>, vector<128x8xf32>,
    %c0_29 = arith.constant 0 : index
    %c0_30 = arith.constant 0 : index
    %79 = vector.load %arg6[%c0_29, %c0_30] : memref<128x32xf32, #tpu.memory_space<vmem>>, vector<128x32xf32>
    %c0_31 = arith.constant 0 : index
    %c0_32 = arith.constant 0 : index
    %c0_33 = arith.constant 0 : index
    %80 = vector.load %arg5[%c0_31, %c0_32, %c0_33] : memref<1x128x32xf32, #tpu.memory_space<vmem>>, vector<1x128x32xf32>
    %81 = vector.shape_cast %80 : vector<1x128x32xf32> to vector<128x32xf32>
    %82 = vector.shape_cast %79 : vector<128x32xf32> to vector<1x128x32xf32>
    tpu.vector_store %arg5[%c0_31, %c0_32, %c0_33], %82 {strides = array<i32>} : memref<1x128x32xf32, #tpu.memory_space<vmem>>, vector<1x128x32xf32>,
    return
  }
  func.func @transform_0(%arg0: i32, %arg1: i32) -> (i32, i32, i32) {
    %c0_i32 = arith.constant 0 : i32
    %c0_i32_0 = arith.constant 0 : i32
    return %arg0, %arg1, %c0_i32 : i32, i32, i32
  }
  func.func @transform_1(%arg0: i32, %arg1: i32) -> (i32, i32, i32) {
    %c0_i32 = arith.constant 0 : i32
    %c0_i32_0 = arith.constant 0 : i32
    %c0_i32_1 = arith.constant 0 : i32
    return %arg0, %c0_i32, %c0_i32_0 : i32, i32, i32
  }
  func.func @transform_2(%arg0: i32, %arg1: i32) -> (i32, i32, i32) {
    %c0_i32 = arith.constant 0 : i32
    %c0_i32_0 = arith.constant 0 : i32
    %c0_i32_1 = arith.constant 0 : i32
    return %arg0, %c0_i32, %c0_i32_0 : i32, i32, i32
  }
  func.func @transform_3(%arg0: i32, %arg1: i32) -> (i32, i32, i32) {
    %c0_i32 = arith.constant 0 : i32
    %c0_i32_0 = arith.constant 0 : i32
    return %arg0, %arg1, %c0_i32 : i32, i32, i32
  }
}

</mosaic_0001>

<bundles_post_ra>
// kernel: tpu_custom_call.1
= control target key start
LH: loop header
LB: loop body
LE: loop exit
PB: predicated region body
PF: predicated region fallthrough
CT: control target
= control target key end

     0   :  { %s2657_s12 = smov 0   ;;  %s2659_s13 = smov 0   ;;  %s3876_s0 = inlined_call_operand.vmem [shape: f32[2,128,32], index: 0, kind: input, shape index: {}]   ;;  %s3877_s1 = inlined_call_operand.vmem [shape: f32[2,128,32], index: 1, kind: input, shape index: {}]   ;;  %s3878_s2 = inlined_call_operand.vmem [shape: f32[2,128,32], index: 2, kind: input, shape index: {}]   ;;  %s3879_s3 = inlined_call_operand.vmem [shape: f32[2,128,32], index: 3, kind: output, shape index: {}]  }
   0x1   :  { %s2661_s14 = smov 0  }
   0x2 LB: > { %s25_s15 = sadd.s32 1, %s2625_s13  ;;  %p2258_p0 = scmp.ge.s32.totalorder %s2629_s14, 1  ;;  %s2629_s14 = sphi %s2661_s14, %s13_s14   ;;  %s2625_s13 = sphi %s2659_s13, %s3889_s13   ;;  %s2621_s12 = sphi %s2657_s12, %s3888_s12  }
   0x3   : > { %p27_p1 = scmp.ge.s32.totalorder %s25_s15, 2  ;;  %p178_p2 = scmp.lt.s32.totalorder %s2629_s14, 3 }
   0x5   : > { %s3891_s15 = smov (%p27_p1, %s25_s15), 0  ;;  %p179_p3 = pnand %p2258_p0, %p178_p2 }
   0x7   : > { %182 = sbr.rel (%p179_p3) target bundleno = 1217 (0x4c1), region = 32 }
   0xc   : > { %p221_p4 = scmp.lt.s32.totalorder %s2621_s12, 1  ;;  %vm442_vm0 = vcmask 64512   ;;  %s2631_s23 = smov 120   ;;  %vm1223_vm1 = vcmask 130112   ;;  %vm1658_vm2 = vcmask 195712   ;;  %vm2093_vm3 = vcmask 261312  }
   0xd   : > { %s2632_s24 = smov 112   ;;  %s2633_s25 = smov 104   ;;  %vm2126_vm4 = vcmask 261120  }
   0xe   : > { %s3893_s12 = smov (!%p221_p4, %s2621_s12), 1  ;;  %s2634_s29 = smov 8  }
   0xf   : > { %s2675_s16 = sshll.u32 %s3893_s12, 7  ;;  %s2635_s30 = smov 16  }
  0x10   : > { %s2681_s19 = scalar_lea.vmem %s3877_s1, %s2675_s16  ;;  %s2690_s22 = scalar_lea.vmem %s3876_s0, %s2675_s16 }
  0x11   : > { %v312_v0 = vld [vmem:[%s2681_s19 + $0x70] sm:$0xff]  ;;  %v313_v1 = vld [vmem:[%s2681_s19 + $0x78] sm:$0xff]  ;;  %v310_v2 = vld [vmem:[%s2681_s19 + $0x60] sm:$0xff]  ;;  %s2831_s28 = scalar_lea.vmem %s3878_s2, %s2675_s16  ;;  %s2636_s4 = smov 24  }
  0x12   : > { %v328_v3 = vpack.c.bf16 %v312_v0, %v312_v0  ;;  %v329_v4 = vpack.c.bf16 %v313_v1, %v313_v1  ;;  %v311_v5 = vld [vmem:[%s2681_s19 + $0x68] sm:$0xff]  ;;  %v326_v6 = vpack.c.bf16 %v310_v2, %v310_v2  ;;  %v306_v7 = vld [vmem:[%s2681_s19 + $0x40] sm:$0xff]  ;;  %v308_v12 = vld [vmem:[%s2681_s19 + $0x50] sm:$0xff]  ;;  %s3816_s7 = scalar_lea.vmem %s3879_s3, %s2675_s16 }
  0x13   : > { %v307_v8 = vld [vmem:[%s2681_s19 + $0x48] sm:$0xff]  ;;  %v327_v9 = vpack.c.bf16 %v311_v5, %v311_v5  ;;  %v322_v10 = vpack.c.bf16 %v306_v7, %v306_v7  ;;  %v254_v16 = vld [vmem:[%s2690_s22 + $0x20] sm:$0xff]  ;;  %v309_v17 = vld [vmem:[%s2681_s19 + $0x58] sm:$0xff]  ;;  %v324_v21 = vpack.c.bf16 %v308_v12, %v308_v12 }
  0x14   : > { %v323_v11 = vpack.c.bf16 %v307_v8, %v307_v8  ;;  %v432_v13 = vunpack.c.l.b16 %v328_v3  ;;  %v433_v14 = vunpack.c.l.b16 %v329_v4  ;;  %v430_v15 = vunpack.c.l.b16 %v326_v6  ;;  %v255_v19 = vld [vmem:[%s2690_s22 + $0x28] sm:$0xff]  ;;  %v304_v27 = vld [vmem:[%s2681_s19 + $0x30] sm:$0xff]  ;;  %v305_v28 = vld [vmem:[%s2681_s19 + $0x38] sm:$0xff] }
  0x15   : > { %v431_v18 = vunpack.c.l.b16 %v327_v9  ;;  %v325_v22 = vpack.c.bf16 %v309_v17, %v309_v17  ;;  %v426_v24 = vunpack.c.l.b16 %v322_v10  ;;  %v270_v26 = vmul.f32 0.35355338, %v254_v16  ;;  %v300_v33 = vld [vmem:[%s2681_s19 + $0x10] sm:$0xff]  ;;  %v301_v37 = vld [vmem:[%s2681_s19 + $0x18] sm:$0xff]  ;;  %v302_v38 = vld [vmem:[%s2681_s19 + $0x20] sm:$0xff] }
  0x16   : > { %v2699_v20 = vpack.c.b16 %v433_v14, %v432_v13  ;;  %v427_v25 = vunpack.c.l.b16 %v323_v11  ;;  %v271_v30 = vmul.f32 0.35355338, %v255_v19  ;;  %v428_v31 = vunpack.c.l.b16 %v324_v21  ;;  %v303_v39 = vld [vmem:[%s2681_s19 + $0x28] sm:$0xff]  ;;  %v256_v45 = vld [vmem:[%s2690_s22 + $0x30] sm:$0xff]  ;;  %v257_v46 = vld [vmem:[%s2690_s22 + $0x38] sm:$0xff] }
  0x17   : > { %v2701_v23 = vpack.c.b16 %v431_v18, %v430_v15  ;;  %v429_v32 = vunpack.c.l.b16 %v325_v22  ;;  %v320_v35 = vpack.c.bf16 %v304_v27, %v304_v27  ;;  %v321_v36 = vpack.c.bf16 %v305_v28, %v305_v28  ;;  %v250_v55 = vld [vmem:[%s2690_s22] sm:$0xff]  ;;  %v251_v56 = vld [vmem:[%s2690_s22 + $0x8] sm:$0xff]  ;;  %v252_v9 = vld [vmem:[%s2690_s22 + $0x10] sm:$0xff] }
  0x18   : > { %835 = vrot.lane.b32.xlu0 %v2699_v20, %s2631_s23  ;;  %v489_v29 = vsel %vm442_vm0, %v2699_v20, 0  ;;  %v286_v40 = vpack.c.bf16 %v270_v26, %v270_v26  ;;  %v2717_v41 = vpack.c.b16 %v427_v25, %v426_v24  ;;  %v287_v42 = vpack.c.bf16 %v271_v30, %v271_v30  ;;  %v253_v12 = vld [vmem:[%s2690_s22 + $0x18] sm:$0xff]  ;;  %v298_v17 = vld [vmem:[%s2681_s19] sm:$0xff]  ;;  %v299_v18 = vld [vmem:[%s2681_s19 + $0x8] sm:$0xff] }
  0x19   : > { %491 = vmatpush.bf16.xpose.msra.mxu0 %v489_v29  ;;  %833 = vrot.lane.b32.xlu1 %v2701_v23, %s2631_s23  ;;  %v2712_v34 = vpack.c.b16 %v429_v32, %v428_v31  ;;  %v424_v43 = vunpack.c.l.b16 %v320_v35  ;;  %v425_v44 = vunpack.c.l.b16 %v321_v36  ;;  %v316_v47 = vpack.c.bf16 %v300_v33, %v300_v33  ;;  %v260_v31 = vld [vmem:[%s2690_s22 + $0x50] sm:$0xff]  ;;  %v261_v32 = vld [vmem:[%s2690_s22 + $0x58] sm:$0xff] }
  0x1a   : > { %v317_v48 = vpack.c.bf16 %v301_v37, %v301_v37  ;;  %v318_v49 = vpack.c.bf16 %v302_v38, %v302_v38  ;;  %v319_v50 = vpack.c.bf16 %v303_v39, %v303_v39  ;;  %v486_v51 = vsel %vm442_vm0, %v2701_v23, 0  ;;  %v258_v38 = vld [vmem:[%s2690_s22 + $0x40] sm:$0xff]  ;;  %v259_v39 = vld [vmem:[%s2690_s22 + $0x48] sm:$0xff] }
  0x1b   : > { %831 = vrot.lane.b32.xlu2 %v2712_v34, %s2631_s23  ;;  %v2725_v52 = vpack.c.b16 %v425_v44, %v424_v43  ;;  %v382_v57 = vunpack.c.l.b16 %v286_v40  ;;  %v383_v58 = vunpack.c.l.b16 %v287_v42  ;;  %v272_v59 = vmul.f32 0.35355338, %v256_v45 }
  0x1c   : > { %v422_v53 = vunpack.c.l.b16 %v318_v49  ;;  %v423_v54 = vunpack.c.l.b16 %v319_v50  ;;  %v273_v60 = vmul.f32 0.35355338, %v257_v46  ;;  %v420_v61 = vunpack.c.l.b16 %v316_v47 }
  0x1d   : > { %v421_v62 = vunpack.c.l.b16 %v317_v48  ;;  %v266_v63 = vmul.f32 0.35355338, %v250_v55  ;;  %v267_v0 = vmul.f32 0.35355338, %v251_v56  ;;  %v2735_v2 = vpack.c.b16 %v383_v58, %v382_v57  ;;  %v262_v55 = vld [vmem:[%s2690_s22 + $0x60] sm:$0xff]  ;;  %v263_v56 = vld [vmem:[%s2690_s22 + $0x68] sm:$0xff] }
  0x1e   : > { %v2733_v1 = vpack.c.b16 %v423_v54, %v422_v53  ;;  %v288_v3 = vpack.c.bf16 %v272_v59, %v272_v59  ;;  %v289_v4 = vpack.c.bf16 %v273_v60, %v273_v60  ;;  %v483_v8 = vsel %vm442_vm0, %v2712_v34, 0 }
  0x1f   : > { %v2739_v5 = vpack.c.b16 %v421_v62, %v420_v61  ;;  %v282_v6 = vpack.c.bf16 %v266_v63, %v266_v63  ;;  %v283_v7 = vpack.c.bf16 %v267_v0, %v267_v0  ;;  %v268_v15 = vmul.f32 0.35355338, %v252_v9 }
  0x20   : > { %829 = vrot.lane.b32.xlu0 %v2717_v41, %s2631_s23  ;;  %v384_v10 = vunpack.c.l.b16 %v288_v3  ;;  %v385_v11 = vunpack.c.l.b16 %v289_v4  ;;  %v269_v16 = vmul.f32 0.35355338, %v253_v12  ;;  %v314_v19 = vpack.c.bf16 %v298_v17, %v298_v17 }
  0x21   : > { %492 = vmatpush.bf16.xpose.msra.mxu0 %v486_v51  ;;  %827 = vrot.lane.b32.xlu1 %v2725_v52, %s2631_s23  ;;  %v378_v13 = vunpack.c.l.b16 %v282_v6  ;;  %v379_v14 = vunpack.c.l.b16 %v283_v7  ;;  %v315_v21 = vpack.c.bf16 %v299_v18, %v299_v18  ;;  %v284_v27 = vpack.c.bf16 %v268_v15, %v268_v15  ;;  %v264_v6 = vld [vmem:[%s2690_s22 + $0x70] sm:$0xff]  ;;  %v265_v7 = vld [vmem:[%s2690_s22 + $0x78] sm:$0xff] }
  0x22   : > { %v2751_v22 = vpack.c.b16 %v385_v11, %v384_v10  ;;  %v418_v24 = vunpack.c.l.b16 %v314_v19  ;;  %v285_v28 = vpack.c.bf16 %v269_v16, %v269_v16  ;;  %v480_v29 = vsel %vm442_vm0, %v2717_v41, 0 }
  0x23   : > { %825 = vrot.lane.b32.xlu2 %v2733_v1, %s2631_s23  ;;  %v419_v25 = vunpack.c.l.b16 %v315_v21  ;;  %v2753_v26 = vpack.c.b16 %v379_v14, %v378_v13  ;;  %v380_v33 = vunpack.c.l.b16 %v284_v27  ;;  %v276_v36 = vmul.f32 0.35355338, %v260_v31  ;;  %v345_v27 = vld [vmem:[%s2831_s28 + $0x78] sm:$0xff] }
  0x24   : > { %v381_v35 = vunpack.c.l.b16 %v285_v28  ;;  %v277_v37 = vmul.f32 0.35355338, %v261_v32  ;;  %v274_v40 = vmul.f32 0.35355338, %v258_v38  ;;  %v275_v42 = vmul.f32 0.35355338, %v259_v39 }
  0x25   : > { %v2757_v30 = vpack.c.b16 %v419_v25, %v418_v24  ;;  %v292_v44 = vpack.c.bf16 %v276_v36, %v276_v36  ;;  %v477_v46 = vsel %vm442_vm0, %v2725_v52, 0  ;;  %v474_v58 = vsel %vm442_vm0, %v2733_v1, 0  ;;  %v344_v25 = vld [vmem:[%s2831_s28 + $0x70] sm:$0xff]  ;;  %v334_v38 = vld [vmem:[%s2831_s28 + $0x20] sm:$0xff]  ;;  %v339_v39 = vld [vmem:[%s2831_s28 + $0x48] sm:$0xff] }
  0x26   : > { %v2769_v43 = vpack.c.b16 %v381_v35, %v380_v33  ;;  %v293_v45 = vpack.c.bf16 %v277_v37, %v277_v37  ;;  %v290_v47 = vpack.c.bf16 %v274_v40, %v274_v40  ;;  %v291_v48 = vpack.c.bf16 %v275_v42, %v275_v42  ;;  %v338_v37 = vld [vmem:[%s2831_s28 + $0x40] sm:$0xff]  ;;  %v335_v40 = vld [vmem:[%s2831_s28 + $0x28] sm:$0xff] }
  0x27   : > { %v388_v51 = vunpack.c.l.b16 %v292_v44  ;;  %v278_v59 = vmul.f32 0.35355338, %v262_v55  ;;  %v279_v60 = vmul.f32 0.35355338, %v263_v56  ;;  %v471_v63 = vsel %vm442_vm0, %v2739_v5, 0 }
  0x28   : > { %809 = vrot.lane.b32.xlu0 %v2735_v2, %s2631_s23  ;;  %v386_v49 = vunpack.c.l.b16 %v290_v47  ;;  %v387_v50 = vunpack.c.l.b16 %v291_v48  ;;  %v389_v53 = vunpack.c.l.b16 %v293_v45  ;;  %v280_v9 = vmul.f32 0.35355338, %v264_v6  ;;  %v340_v47 = vld [vmem:[%s2831_s28 + $0x50] sm:$0xff]  ;;  %v341_v48 = vld [vmem:[%s2831_s28 + $0x58] sm:$0xff] }
  0x29   : > { %493 = vmatpush.bf16.xpose.msra.mxu0 %v483_v8  ;;  %823 = vrot.lane.b32.xlu1 %v2739_v5, %s2631_s23  ;;  %v294_v61 = vpack.c.bf16 %v278_v59, %v278_v59  ;;  %v295_v62 = vpack.c.bf16 %v279_v60, %v279_v60  ;;  %v468_v8 = vsel %vm442_vm0, %v2757_v30, 0  ;;  %v281_v10 = vmul.f32 0.35355338, %v265_v7 }
  0x2a   : > { %v2777_v54 = vpack.c.b16 %v387_v50, %v386_v49  ;;  %v2783_v57 = vpack.c.b16 %v389_v53, %v388_v51  ;;  %v296_v11 = vpack.c.bf16 %v280_v9, %v280_v9  ;;  %v360_v28 = vpack.c.bf16 %v344_v25, %v344_v25  ;;  %v331_v9 = vld [vmem:[%s2831_s28 + $0x8] sm:$0xff] }
  0x2b   : > { %821 = vrot.lane.b32.xlu2 %v2757_v30, %s2631_s23  ;;  %v390_v0 = vunpack.c.l.b16 %v294_v61  ;;  %v391_v3 = vunpack.c.l.b16 %v295_v62  ;;  %v297_v12 = vpack.c.bf16 %v281_v10, %v281_v10  ;;  %v350_v42 = vpack.c.bf16 %v334_v38, %v334_v38 }
  0x2c   : > { %v392_v13 = vunpack.c.l.b16 %v296_v11  ;;  %v690_v32 = vunpack.c.l.b16 %v360_v28  ;;  %v351_v44 = vpack.c.bf16 %v335_v40, %v335_v40  ;;  %v355_v49 = vpack.c.bf16 %v339_v39, %v339_v39 }
  0x2d   : > { %v2799_v4 = vpack.c.b16 %v391_v3, %v390_v0  ;;  %v393_v14 = vunpack.c.l.b16 %v297_v12  ;;  %v356_v51 = vpack.c.bf16 %v340_v47, %v340_v47  ;;  %v357_v53 = vpack.c.bf16 %v341_v48, %v341_v48  ;;  %v332_v0 = vld [vmem:[%s2831_s28 + $0x10] sm:$0xff]  ;;  %v333_v3 = vld [vmem:[%s2831_s28 + $0x18] sm:$0xff] }
  0x2e   : > { %v681_v50 = vunpack.c.l.b16 %v351_v44  ;;  %v685_v59 = vunpack.c.l.b16 %v355_v49  ;;  %v348_v6 = vpack.c.bf16 %v332_v0, %v332_v0  ;;  %v349_v7 = vpack.c.bf16 %v333_v3, %v333_v3 }
  0x2f   : > { %v2819_v15 = vpack.c.b16 %v393_v14, %v392_v13  ;;  %v686_v56 = vunpack.c.l.b16 %v356_v51  ;;  %v347_v11 = vpack.c.bf16 %v331_v9, %v331_v9 }
  0x30   : > { %811 = vrot.lane.b32.xlu0 %v2751_v22, %s2631_s23  ;;  %v679_v12 = vunpack.c.l.b16 %v349_v7 }
  0x31   : > { %494 = vmatpush.bf16.xpose.msra.mxu0 %v480_v29  ;;  %805 = vrot.lane.b32.xlu1 %v2753_v26, %s2631_s23  ;;  %v361_v29 = vpack.c.bf16 %v345_v27, %v345_v27 }
  0x33   : > { %813 = vrot.lane.b32.xlu2 %v2777_v54, %s2631_s23  ;;  %v691_v33 = vunpack.c.l.b16 %v361_v29 }
  0x35   : > { %v2851_v36 = vpack.c.b16 %v691_v33, %v690_v32 }
  0x37   : > { %708 = vmatpush.bf16.msra.mxu1 %v2851_v36 }
  0x38   : > { %1270 = vrot.lane.b32.xlu0 %v2699_v20, %s2632_s24 }
  0x39   : > { %495 = vmatpush.bf16.xpose.msra.mxu0 %v477_v46  ;;  %807 = vrot.lane.b32.xlu1 %v2769_v43, %s2631_s23  ;;  %v680_v46 = vunpack.c.l.b16 %v350_v42 }
  0x3b   : > { %1264 = vrot.lane.b32.xlu2 %v2717_v41, %s2632_s24  ;;  %v2865_v55 = vpack.c.b16 %v681_v50, %v680_v46 }
  0x40   : > { %1268 = vrot.lane.b32.xlu0 %v2701_v23, %s2632_s24 }
  0x41   : > { %496 = vmatpush.bf16.xpose.msra.mxu0 %v474_v58  ;;  %815 = vrot.lane.b32.xlu1 %v2783_v57, %s2631_s23  ;;  %v687_v58 = vunpack.c.l.b16 %v357_v53 }
  0x43   : > { %1262 = vrot.lane.b32.xlu2 %v2725_v52, %s2632_s24  ;;  %v2873_v60 = vpack.c.b16 %v687_v58, %v686_v56 }
  0x48   : > { %1266 = vrot.lane.b32.xlu0 %v2712_v34, %s2632_s24 }
  0x49   : > { %497 = vmatpush.bf16.xpose.msra.mxu0 %v471_v63  ;;  %1260 = vrot.lane.b32.xlu1 %v2733_v1, %s2632_s24 }
  0x4b   : > { %1703 = vrot.lane.b32.xlu2 %v2701_v23, %s2633_s25  ;;  %v343_v23 = vld [vmem:[%s2831_s28 + $0x68] sm:$0xff] }
  0x4c   : > { %v359_v19 = vpack.c.bf16 %v343_v23, %v343_v23 }
  0x50   : > { %817 = vrot.lane.b32.xlu0 %v2799_v4, %s2631_s23 }
  0x51   : > { %498 = vmatpush.bf16.xpose.msra.mxu0 %v468_v8  ;;  %1258 = vrot.lane.b32.xlu1 %v2739_v5, %s2632_s24  ;;  %v330_v8 = vld [vmem:[%s2831_s28] sm:$0xff] }
  0x52   : > { %v346_v10 = vpack.c.bf16 %v330_v8, %v330_v8 }
  0x53   : > { %1701 = vrot.lane.b32.xlu2 %v2712_v34, %s2633_s25  ;;  %v336_v34 = vld [vmem:[%s2831_s28 + $0x30] sm:$0xff] }
  0x54   : > { %v352_v16 = vpack.c.bf16 %v336_v34, %v336_v34  ;;  %v676_v14 = vunpack.c.l.b16 %v346_v10 }
  0x56   : > { %v682_v21 = vunpack.c.l.b16 %v352_v16 }
  0x58   : > { %1705 = vrot.lane.b32.xlu0 %v2699_v20, %s2633_s25  ;;  %2267 = vmatmul.msk.bf16.vlgmr.msra.gmra.mxu0 %vm442_vm0, %v2753_v26  ;;  %v342_v20 = vld [vmem:[%s2831_s28 + $0x60] sm:$0xff] }
  0x59   : > { %1699 = vrot.lane.b32.xlu1 %v2717_v41, %s2633_s25  ;;  %v337_v41 = vld [vmem:[%s2831_s28 + $0x38] sm:$0xff]  ;;  %v358_v18 = vpack.c.bf16 %v342_v20, %v342_v20  ;;  %v677_v20 = vunpack.c.l.b16 %v347_v11 }
  0x5a   : > { %v353_v17 = vpack.c.bf16 %v337_v41, %v337_v41 }
  0x5b   : > { %1240 = vrot.lane.b32.xlu2 %v2753_v26, %s2632_s24  ;;  %v688_v35 = vunpack.c.l.b16 %v358_v18  ;;  %v2905_v16 = vpack.c.b16 %v677_v20, %v676_v14 }
  0x5c   : > { %v683_v24 = vunpack.c.l.b16 %v353_v17 }
  0x5e   : > { %v2845_v31 = vpack.c.b16 %v683_v24, %v682_v21 }
  0x60   : > { %819 = vrot.lane.b32.xlu0 %v2819_v15, %s2631_s23 }
  0x61   : > { %1060 = vrot.lane.b32.xlu1 %v2845_v31, %s2631_s23 }
  0x63   : > { %1695 = vrot.lane.b32.xlu2 %v2733_v1, %s2633_s25  ;;  %v689_v1 = vunpack.c.l.b16 %v359_v19 }
  0x65   : > { %v2858_v45 = vpack.c.b16 %v689_v1, %v688_v35 }
  0x67   : > { %709 = vmatpush.bf16.msra.mxu1 %v2858_v45 }
  0x68   : > { %1256 = vrot.lane.b32.xlu0 %v2757_v30, %s2632_s24  ;;  %2268 = vmatmul.msk.bf16.gmra.mxu0 %vm442_vm0, %v2769_v43 }
  0x69   : > { %1058 = vrot.lane.b32.xlu1 %v2865_v55, %s2631_s23 }
  0x6b   : > { %1693 = vrot.lane.b32.xlu2 %v2739_v5, %s2633_s25  ;;  %710 = vmatpush.bf16.msra.mxu1 %v2873_v60 }
  0x70   : > { %1697 = vrot.lane.b32.xlu0 %v2725_v52, %s2633_s25  ;;  %v354_v52 = vpack.c.bf16 %v338_v37, %v338_v37 }
  0x71   : > { %1246 = vrot.lane.b32.xlu1 %v2751_v22, %s2632_s24 }
  0x72   : > { %v684_v5 = vunpack.c.l.b16 %v354_v52 }
  0x73   : > { %1068 = vrot.lane.b32.xlu2 %v2851_v36, %s2631_s23 }
  0x74   : > { %v2878_v62 = vpack.c.b16 %v685_v59, %v684_v5 }
  0x75   : > { %v832_v61 = vpop.permute.xlu2 %831 }
  0x76   : > { %711 = vmatpush.bf16.msra.mxu1 %v2878_v62 }
  0x78   : > { %1242 = vrot.lane.b32.xlu0 %v2769_v43, %s2632_s24  ;;  %2269 = vmatmul.msk.bf16.gmra.mxu0 %vm442_vm0, %v2735_v2 }
  0x79   : > { %1677 = vrot.lane.b32.xlu1 %v2769_v43, %s2633_s25 }
  0x7a   : > { %712 = vmatpush.bf16.msra.mxu1 %v2845_v31 }
  0x7b   : > { %1244 = vrot.lane.b32.xlu2 %v2735_v2, %s2632_s24 }
  0x7d   : > { %v826_v63 = vpop.permute.xlu2 %825 }
  0x7e   : > { %713 = vmatpush.bf16.msra.mxu1 %v2865_v55  ;;  %v868_v40 = vsel %vm442_vm0, %v826_v63, 0 }
  0x80   : > { %1691 = vrot.lane.b32.xlu0 %v2757_v30, %s2633_s25  ;;  %v678_v30 = vunpack.c.l.b16 %v348_v6 }
  0x81   : > { %1250 = vrot.lane.b32.xlu1 %v2783_v57, %s2632_s24 }
  0x82   : > { %v2899_v13 = vpack.c.b16 %v679_v12, %v678_v30 }
  0x83   : > { %1064 = vrot.lane.b32.xlu2 %v2873_v60, %s2631_s23 }
  0x84   : > { %714 = vmatpush.bf16.msra.mxu1 %v2899_v13 }
  0x85   : > { %v822_v41 = vpop.permute.xlu2 %821 }
  0x86   : > { %v862_v53 = vsel %vm442_vm0, %v822_v41, 0 }
  0x88   : > { %1066 = vrot.lane.b32.xlu0 %v2858_v45, %s2631_s23  ;;  %2270 = vmatmul.msk.bf16.gmra.mxu0 %vm442_vm0, %v2751_v22 }
  0x89   : > { %715 = vmatpush.bf16.msra.mxu1 %v2905_v16 }
  0x8a   : > { %v836_v23 = vpop.permute.xlu0 %835 }
  0x8b   : > { %v883_v34 = vsel %vm442_vm0, %v836_v23, 0  ;;  %v834_v17 = vpop.permute.xlu1 %833  ;;  %1056 = vrot.lane.b32.xlu2 %v2899_v13, %s2631_s23 }
  0x8c   : > { %885 = vmatpush.bf16.xpose.msra.mxu2 %v883_v34  ;;  %v880_v43 = vsel %vm442_vm0, %v834_v17, 0 }
  0x8d   : > { %v2915_v19 = vpop.permute.xlu2 %813 }
  0x90   : > { %1675 = vrot.lane.b32.xlu0 %v2753_v26, %s2633_s25  ;;  %v877_v26 = vsel %vm442_vm0, %v832_v61, 0 }
  0x92   : > { %v830_v18 = vpop.permute.xlu0 %829 }
  0x93   : > { %v828_v21 = vpop.permute.xlu1 %827  ;;  %1248 = vrot.lane.b32.xlu2 %v2777_v54, %s2632_s24  ;;  %v874_v29 = vsel %vm442_vm0, %v830_v18, 0 }
  0x94   : > { %886 = vmatpush.bf16.xpose.msra.mxu2 %v880_v43  ;;  %v871_v33 = vsel %vm442_vm0, %v828_v21, 0 }
  0x95   : > { %v1265_v25 = vpop.permute.xlu2 %1264 }
  0x96   : > { %v1309_v50 = vsel %vm442_vm0, %v1265_v25, 0 }
  0x98   : > { %1062 = vrot.lane.b32.xlu0 %v2878_v62, %s2631_s23  ;;  %2271 = vmatmul.msk.bf16.gmra.mxu0 %vm442_vm0, %v2777_v54 }
  0x9a   : > { %v2922_v24 = vpop.permute.xlu0 %809 }
  0x9b   : > { %v824_v28 = vpop.permute.xlu1 %823  ;;  %1679 = vrot.lane.b32.xlu2 %v2735_v2, %s2633_s25 }
  0x9c   : > { %887 = vmatpush.bf16.xpose.msra.mxu2 %v877_v26  ;;  %v865_v52 = vsel %vm442_vm0, %v824_v28, 0 }
  0x9d   : > { %v1263_v32 = vpop.permute.xlu2 %1262 }
  0x9e   : > { %v1306_v58 = vsel %vm442_vm0, %v1263_v32, 0 }
  0xa0   : > { %1054 = vrot.lane.b32.xlu0 %v2905_v16, %s2631_s23 }
  0xa2   : > { %v2928_v27 = vpop.permute.xlu0 %811 }
  0xa3   : > { %v806_v37 = vpop.permute.xlu1 %805 }
  0xa4   : > { %888 = vmatpush.bf16.xpose.msra.mxu2 %v874_v29 }
  0xa5   : > { %v1704_v38 = vpop.permute.xlu2 %1703 }
  0xa6   : > { %v2960_v0 = vsel %vm442_vm0, %v1704_v38, 0 }
  0xa8   : > { %2272 = vmatmul.msk.bf16.gmra.mxu0 %vm442_vm0, %v2783_v57 }
  0xaa   : > { %v1271_v35 = vpop.permute.xlu0 %1270 }
  0xab   : > { %v1318_v1 = vsel %vm442_vm0, %v1271_v35, 0  ;;  %v808_v2 = vpop.permute.xlu1 %807 }
  0xac   : > { %889 = vmatpush.bf16.xpose.msra.mxu2 %v871_v33  ;;  %1320 = vmatpush.bf16.xpose.msrb.mxu1 %v1318_v1 }
  0xad   : > { %v1702_v44 = vpop.permute.xlu2 %1701 }
  0xae   : > { %v2970_v10 = vsel %vm442_vm0, %v1702_v44, 0 }
  0xb2   : > { %v1269_v39 = vpop.permute.xlu0 %1268 }
  0xb3   : > { %v1315_v42 = vsel %vm442_vm0, %v1269_v39, 0  ;;  %v2945_v49 = vpop.permute.xlu1 %815 }
  0xb4   : > { %890 = vmatpush.bf16.xpose.msra.mxu2 %v868_v40  ;;  %1321 = vmatpush.bf16.xpose.msrb.mxu1 %v1315_v42 }
  0xb5   : > { %v2943_v48 = vpop.permute.xlu2 %1240 }
  0xb8   : > { %2273 = vmatmul.msk.bf16.gmra.mxu0 %vm442_vm0, %v2799_v4 }
  0xba   : > { %v1267_v46 = vpop.permute.xlu0 %1266 }
  0xbb   : > { %v1312_v47 = vsel %vm442_vm0, %v1267_v46, 0  ;;  %v1261_v59 = vpop.permute.xlu1 %1260 }
  0xbc   : > { %891 = vmatpush.bf16.xpose.msra.mxu2 %v865_v52  ;;  %1322 = vmatpush.bf16.xpose.msrb.mxu1 %v1312_v47  ;;  %v1303_v3 = vsel %vm442_vm0, %v1261_v59, 0 }
  0xbd   : > { %v1696_v56 = vpop.permute.xlu2 %1695 }
  0xbe   : > { %v3000_v25 = vsel %vm442_vm0, %v1696_v56, 0 }
  0xc2   : > { %v2948_v51 = vpop.permute.xlu0 %817 }
  0xc3   : > { %v1259_v7 = vpop.permute.xlu1 %1258 }
  0xc4   : > { %892 = vmatpush.bf16.xpose.msra.mxu2 %v862_v53  ;;  %1323 = vmatpush.bf16.xpose.msrb.mxu1 %v1309_v50  ;;  %v1300_v11 = vsel %vm442_vm0, %v1259_v7, 0 }
  0xc5   : > { %v1694_v63 = vpop.permute.xlu2 %1693 }
  0xc8   : > { %2274 = vmatmul.msk.bf16.gmra.mxu0 %vm442_vm0, %v2819_v15 }
  0xca   : > { %v1706_v5 = vpop.permute.xlu0 %1705 }
  0xcb   : > { %2275 = vmatmul.msk.bf16.vlgmr.msra.gmra.mxu2 %vm442_vm0, %v806_v37  ;;  %v2956_v61 = vsel %vm442_vm0, %v1706_v5, 0  ;;  %v1700_v14 = vpop.permute.xlu1 %1699 }
  0xcc   : > { %1755 = vmatpush.bf16.xpose.msrb.mxu0 %v2956_v61  ;;  %1324 = vmatpush.bf16.xpose.msrb.mxu1 %v1306_v58  ;;  %v2979_v20 = vsel %vm442_vm0, %v1700_v14, 0 }
  0xcd   : > { %v1069_v9 = vpop.permute.xlu2 %1068 }
  0xce   : > { %1078 = vmatpush.bf16.msra.mxu3 %v1069_v9 }
  0xd2   : > { %v2963_v6 = vpop.permute.xlu0 %819 }
  0xd3   : > { %v1061_v32 = vpop.permute.xlu1 %1060 }
  0xd4   : > { %1756 = vmatpush.bf16.xpose.msrb.mxu0 %v2960_v0  ;;  %1325 = vmatpush.bf16.xpose.msrb.mxu1 %v1303_v3 }
  0xd5   : > { %v2966_v8 = vpop.f32.mrf.mxu0  ;;  %v2997_v26 = vpop.permute.xlu2 %1244 }
  0xd6   : > { %540 = vmax.xlane.f32.xlu0 %v2966_v8 }
  0xda   : > { %v1257_v30 = vpop.permute.xlu0 %1256 }
  0xdb   : > { %2276 = vmatmul.msk.bf16.gmra.mxu2 %vm442_vm0, %v808_v2  ;;  %v1297_v23 = vsel %vm442_vm0, %v1257_v30, 0  ;;  %v1059_v38 = vpop.permute.xlu1 %1058 }
  0xdc   : > { %1757 = vmatpush.bf16.xpose.msrb.mxu0 %v2970_v10  ;;  %1326 = vmatpush.bf16.xpose.msrb.mxu1 %v1300_v11 }
  0xdd   : > { %v2975_v12 = vpop.f32.mrf.mxu0  ;;  %v1065_v33 = vpop.permute.xlu2 %1064 }
  0xde   : > { %542 = vmax.xlane.f32.xlu0 %v2975_v12 }
  0xe2   : > { %v1698_v34 = vpop.permute.xlu0 %1697 }
  0xe3   : > { %v2987_v17 = vsel %vm442_vm0, %v1698_v34, 0  ;;  %v3028_v42 = vpop.permute.xlu1 %1246 }
  0xe4   : > { %1758 = vmatpush.bf16.xpose.msrb.mxu0 %v2979_v20  ;;  %1327 = vmatpush.bf16.xpose.msrb.mxu1 %v1297_v23 }
  0xe5   : > { %v2983_v41 = vpop.f32.mrf.mxu0  ;;  %v1057_v2 = vpop.permute.xlu2 %1056 }
  0xe6   : > { %544 = vmax.xlane.f32.xlu1 %v2983_v41 }
  0xea   : > { %v2989_v43 = vpop.permute.xlu0 %1242 }
  0xeb   : > { %2277 = vmatmul.msk.bf16.gmra.mxu2 %vm442_vm0, %v2922_v24  ;;  %v3009_v24 = vsel %vm442_vm0, %v1694_v63, 0  ;;  %v1678_v46 = vpop.permute.xlu1 %1677 }
  0xec   : > { %1759 = vmatpush.bf16.xpose.msrb.mxu0 %v2987_v17 }
  0xed   : > { %v2994_v18 = vpop.f32.mrf.mxu0  ;;  %v3039_v47 = vpop.permute.xlu2 %1248 }
  0xee   : > { %546 = vmax.xlane.f32.xlu1 %v2994_v18 }
  0xf2   : > { %v1692_v21 = vpop.permute.xlu0 %1691 }
  0xf3   : > { %v3016_v37 = vsel %vm442_vm0, %v1692_v21, 0 }
  0xf4   : > { %1760 = vmatpush.bf16.xpose.msrb.mxu0 %v3000_v25 }
  0xf5   : > { %v3003_v28 = vpop.f32.mrf.mxu0  ;;  %v1680_v53 = vpop.permute.xlu2 %1679 }
  0xf6   : > { %548 = vmax.xlane.f32.xlu2 %v3003_v28 }
  0xfa   : > { %v1067_v29 = vpop.permute.xlu0 %1066 }
  0xfb   : > { %2278 = vmatmul.msk.bf16.gmra.mxu2 %vm442_vm0, %v2928_v27  ;;  %1079 = vmatpush.bf16.msra.mxu3 %v1067_v29 }
  0xfc   : > { %1761 = vmatpush.bf16.xpose.msrb.mxu0 %v3009_v24 }
  0xfd   : > { %v3012_v35 = vpop.f32.mrf.mxu0 }
  0xfe   : > { %550 = vmax.xlane.f32.xlu2 %v3012_v35 }
  0xff   : > { %1080 = vmatpush.bf16.msra.mxu3 %v1065_v33 }
 0x102   : > { %v1676_v1 = vpop.permute.xlu0 %1675 }
 0x104   : > { %1762 = vmatpush.bf16.xpose.msrb.mxu0 %v3016_v37 }
 0x105   : > { %v3019_v27 = vpop.f32.mrf.mxu0 }
 0x106   : > { %552 = vmax.xlane.f32.xlu0 %v3019_v27 }
 0x10a   : > { %v1063_v39 = vpop.permute.xlu0 %1062 }
 0x10b   : > { %2279 = vmatmul.msk.bf16.gmra.mxu2 %vm442_vm0, %v2915_v19  ;;  %1081 = vmatpush.bf16.msra.mxu3 %v1063_v39 }
 0x10c   : > { %2291 = vmatmul.msk.bf16.vlgmr.msrb.gmra.mxu0 %vm442_vm0, %v1676_v1 }
 0x10d   : > { %v3025_v40 = vpop.f32.mrf.mxu0 }
 0x10e   : > { %554 = vmax.xlane.f32.xlu1 %v3025_v40 }
 0x10f   : > { %1082 = vmatpush.bf16.msra.mxu3 %v1061_v32 }
 0x112   : > { %v1055_v52 = vpop.permute.xlu0 %1054 }
 0x113   : > { %1083 = vmatpush.bf16.msra.mxu3 %v1059_v38 }
 0x115   : > { %v3030_v44 = vpop.f32.mrf.mxu0 }
 0x116   : > { %556 = vmax.xlane.f32.xlu2 %v3030_v44 }
 0x117   : > { %1084 = vmatpush.bf16.msra.mxu3 %v1057_v2 }
 0x11b   : > { %2280 = vmatmul.msk.bf16.gmra.mxu2 %vm442_vm0, %v2945_v49  ;;  %1085 = vmatpush.bf16.msra.mxu3 %v1055_v52 }
 0x11c   : > { %2292 = vmatmul.msk.bf16.gmra.mxu0 %vm442_vm0, %v1678_v46 }
 0x11d   : > { %v3036_v19 = vpop.f32.mrf.mxu0 }
 0x11e   : > { %558 = vmax.xlane.f32.xlu0 %v3036_v19 }
 0x125   : > { %v3041_v50 = vpop.f32.mrf.mxu0 }
 0x126   : > { %560 = vmax.xlane.f32.xlu1 %v3041_v50 }
 0x12b   : > { %2281 = vmatmul.msk.bf16.gmra.mxu2 %vm442_vm0, %v2948_v51 }
 0x12c   : > { %2293 = vmatmul.msk.bf16.gmra.mxu0 %vm442_vm0, %v1680_v53 }
 0x12d   : > { %v3047_v49 = vpop.f32.mrf.mxu0 }
 0x12e   : > { %562 = vmax.xlane.f32.xlu2 %v3047_v49 }
 0x135   : > { %v3050_v56 = vpop.f32.mrf.mxu0 }
 0x136   : > { %564 = vmax.xlane.f32.xlu0 %v3050_v56 }
 0x13b   : > { %2282 = vmatmul.msk.bf16.gmra.mxu2 %vm442_vm0, %v2963_v6  ;;  %v3068_v6 = vpop.permute.xlu1 %1250 }
 0x13d   : > { %v3055_v58 = vpop.f32.mrf.mxu0 }
 0x13e   : > { %566 = vmax.xlane.f32.xlu1 %v3055_v58 }
 0x145   : > { %v3058_v5 = vpop.f32.mrf.mxu0 }
 0x146   : > { %568 = vmax.xlane.f32.xlu2 %v3058_v5 }
 0x149   : > { %v541_v51 = vpop.xlane.xlu0 %540 }
 0x14a   : > { %v572_v59 = vsub.f32 %v2966_v8, %v541_v51 }
 0x14c   : > { %v588_v63 = vmul.f32 1.442695, %v572_v59 }
 0x14d   : > { %v3062_v3 = vpop.f32.mrf.mxu0 }
 0x14e   : > { %2351 = vpow2.f32 %v588_v63  ;;  %v3064_v7 = vpop.f32.mrf.mxu2  ;;  %570 = vmax.xlane.f32.xlu0 %v3062_v3 }
 0x14f   : > { %934 = vmax.xlane.f32.xlu2 %v3064_v7 }
 0x151   : > { %v543_v9 = vpop.xlane.xlu0 %542 }
 0x152   : > { %v573_v11 = vsub.f32 %v2975_v12, %v543_v9 }
 0x154   : > { %v2352_v30 = vpop.eup %2351  ;;  %v590_v14 = vmul.f32 1.442695, %v573_v11 }
 0x155   : > { %620 = vadd.xlane.f32.xlu1 %v2352_v30 }
 0x156   : > { %2353 = vpow2.f32 %v590_v14  ;;  %v3071_v8 = vpop.f32.mrf.mxu2 }
 0x157   : > { %936 = vmax.xlane.f32.xlu0 %v3071_v8 }
 0x159   : > { %v545_v23 = vpop.xlane.xlu1 %544 }
 0x15a   : > { %v574_v34 = vsub.f32 %v2983_v41, %v545_v23 }
 0x15c   : > { %v2354_v21 = vpop.eup %2353  ;;  %v592_v29 = vmul.f32 1.442695, %v574_v34 }
 0x15d   : > { %622 = vadd.xlane.f32.xlu2 %v2354_v21  ;;  %v652_v32 = vpack.c.bf16 %v2354_v21, %v2352_v30 }
 0x15e   : > { %2355 = vpow2.f32 %v592_v29  ;;  %v3075_v33 = vpop.f32.mrf.mxu2 }
 0x15f   : > { %716 = vmatmul.bf16.vlgmr.msra.gmra.mxu1 %v652_v32  ;;  %938 = vmax.xlane.f32.xlu1 %v3075_v33 }
 0x160   : > { %2305 = vmatpush.bf16.xpose.msra.mxu1 %v2956_v61 }
 0x161   : > { %v547_v12 = vpop.xlane.xlu1 %546 }
 0x162   : > { %v575_v1 = vsub.f32 %v2994_v18, %v547_v12 }
 0x164   : > { %v2356_v38 = vpop.eup %2355  ;;  %v594_v39 = vmul.f32 1.442695, %v575_v1 }
 0x165   : > { %624 = vadd.xlane.f32.xlu2 %v2356_v38 }
 0x166   : > { %2357 = vpow2.f32 %v594_v39  ;;  %v3080_v41 = vpop.f32.mrf.mxu2 }
 0x167   : > { %940 = vmax.xlane.f32.xlu0 %v3080_v41 }
 0x168   : > { %2306 = vmatpush.bf16.xpose.msra.mxu1 %v2960_v0 }
 0x169   : > { %v549_v2 = vpop.xlane.xlu2 %548 }
 0x16a   : > { %v576_v52 = vsub.f32 %v3003_v28, %v549_v2 }
 0x16c   : > { %v2358_v46 = vpop.eup %2357  ;;  %v596_v53 = vmul.f32 1.442695, %v576_v52 }
 0x16d   : > { %v653_v51 = vpack.c.bf16 %v2358_v46, %v2356_v38 }
 0x16e   : > { %v3085_v61 = vpop.f32.mrf.mxu2  ;;  %2359 = vpow2.f32 %v596_v53 }
 0x16f   : > { %721 = vmatmul.bf16.gmra.mxu1 %v653_v51  ;;  %942 = vmax.xlane.f32.xlu2 %v3085_v61 }
 0x170   : > { %2307 = vmatpush.bf16.xpose.msra.mxu1 %v2970_v10  ;;  %626 = vadd.xlane.f32.xlu0 %v2358_v46 }
 0x171   : > { %v551_v18 = vpop.xlane.xlu2 %550 }
 0x172   : > { %v577_v59 = vsub.f32 %v3012_v35, %v551_v18 }
 0x174   : > { %v598_v63 = vmul.f32 1.442695, %v577_v59  ;;  %v2360_v0 = vpop.eup %2359 }
 0x176   : > { %2361 = vpow2.f32 %v598_v63  ;;  %v3090_v9 = vpop.f32.mrf.mxu2 }
 0x177   : > { %944 = vmax.xlane.f32.xlu1 %v3090_v9  ;;  %628 = vadd.xlane.f32.xlu2 %v2360_v0 }
 0x178   : > { %2308 = vmatpush.bf16.xpose.msra.mxu1 %v2979_v20 }
 0x179   : > { %v553_v28 = vpop.xlane.xlu0 %552 }
 0x17a   : > { %v578_v11 = vsub.f32 %v3019_v27, %v553_v28 }
 0x17c   : > { %v2362_v30 = vpop.eup %2361  ;;  %v600_v14 = vmul.f32 1.442695, %v578_v11 }
 0x17d   : > { %v654_v10 = vpack.c.bf16 %v2362_v30, %v2360_v0 }
 0x17e   : > { %2363 = vpow2.f32 %v600_v14  ;;  %v3096_v23 = vpop.f32.mrf.mxu2 }
 0x17f   : > { %726 = vmatmul.bf16.gmra.mxu1 %v654_v10  ;;  %630 = vadd.xlane.f32.xlu1 %v2362_v30 }
 0x180   : > { %2309 = vmatpush.bf16.xpose.msra.mxu1 %v2987_v17 }
 0x181   : > { %v555_v35 = vpop.xlane.xlu1 %554 }
 0x182   : > { %v579_v34 = vsub.f32 %v3025_v40, %v555_v35 }
 0x184   : > { %v2364_v21 = vpop.eup %2363  ;;  %v602_v29 = vmul.f32 1.442695, %v579_v34  ;;  %1681 = vrot.lane.b32.xlu0 %v2751_v22, %s2633_s25 }
 0x185   : > { %632 = vadd.xlane.f32.xlu2 %v2364_v21 }
 0x186   : > { %2365 = vpow2.f32 %v602_v29  ;;  %v3103_v12 = vpop.f32.mrf.mxu2 }
 0x188   : > { %2310 = vmatpush.bf16.xpose.msra.mxu1 %v3000_v25 }
 0x189   : > { %v557_v20 = vpop.xlane.xlu2 %556 }
 0x18a   : > { %v580_v27 = vsub.f32 %v3030_v44, %v557_v20 }
 0x18c   : > { %v2366_v32 = vpop.eup %2365  ;;  %v604_v17 = vmul.f32 1.442695, %v580_v27  ;;  %1252 = vrot.lane.b32.xlu0 %v2799_v4, %s2632_s24 }
 0x18d   : > { %634 = vadd.xlane.f32.xlu1 %v2366_v32  ;;  %948 = vmax.xlane.f32.xlu2 %v3103_v12  ;;  %v655_v40 = vpack.c.bf16 %v2366_v32, %v2364_v21 }
 0x18e   : > { %2367 = vpow2.f32 %v604_v17  ;;  %v3126_v63 = vpop.f32.mrf.mxu2 }
 0x18f   : > { %731 = vmatmul.bf16.gmra.mxu1 %v655_v40 }
 0x190   : > { %2311 = vmatpush.bf16.xpose.msra.mxu1 %v3009_v24 }
 0x191   : > { %v559_v22 = vpop.xlane.xlu0 %558 }
 0x192   : > { %v581_v25 = vsub.f32 %v3036_v19, %v559_v22 }
 0x194   : > { %v2368_v1 = vpop.eup %2367  ;;  %v606_v44 = vmul.f32 1.442695, %v581_v25 }
 0x195   : > { %636 = vadd.xlane.f32.xlu1 %v2368_v1 }
 0x196   : > { %2369 = vpow2.f32 %v606_v44  ;;  %v3134_v30 = vpop.f32.mrf.mxu2 }
 0x198   : > { %2312 = vmatpush.bf16.xpose.msra.mxu1 %v3016_v37 }
 0x199   : > { %v561_v38 = vpop.xlane.xlu1 %560 }
 0x19a   : > { %v582_v2 = vsub.f32 %v3041_v50, %v561_v38 }
 0x19c   : > { %v3111_v39 = vpop.eup %2369  ;;  %v608_v24 = vmul.f32 1.442695, %v582_v2 }
 0x19d   : > { %946 = vmax.xlane.f32.xlu1 %v3096_v23  ;;  %v656_v52 = vpack.c.bf16 %v3111_v39, %v2368_v1 }
 0x19e   : > { %2371 = vpow2.f32 %v608_v24  ;;  %v3142_v27 = vpop.f32.mrf.mxu2 }
 0x19f   : > { %736 = vmatmul.bf16.gmra.mxu1 %v656_v52 }
 0x1a1   : > { %v563_v46 = vpop.xlane.xlu2 %562 }
 0x1a2   : > { %v583_v19 = vsub.f32 %v3047_v49, %v563_v46 }
 0x1a4   : > { %v610_v53 = vmul.f32 1.442695, %v583_v19  ;;  %v3119_v51 = vpop.eup %2371 }
 0x1a5   : > { %1683 = vrot.lane.b32.xlu2 %v2777_v54, %s2633_s25 }
 0x1a6   : > { %2373 = vpow2.f32 %v610_v53 }
 0x1a9   : > { %v565_v37 = vpop.xlane.xlu0 %564 }
 0x1aa   : > { %v584_v50 = vsub.f32 %v3050_v56, %v565_v37 }
 0x1ac   : > { %v3121_v18 = vpop.eup %2373  ;;  %v612_v49 = vmul.f32 1.442695, %v584_v50 }
 0x1ad   : > { %v657_v59 = vpack.c.bf16 %v3121_v18, %v3119_v51 }
 0x1ae   : > { %2375 = vpow2.f32 %v612_v49 }
 0x1af   : > { %741 = vmatmul.bf16.gmra.mxu1 %v657_v59 }
 0x1b1   : > { %v567_v0 = vpop.xlane.xlu1 %566 }
 0x1b2   : > { %v585_v28 = vsub.f32 %v3055_v58, %v567_v0 }
 0x1b4   : > { %v614_v11 = vmul.f32 1.442695, %v585_v28  ;;  %v3132_v56 = vpop.eup %2375 }
 0x1b6   : > { %2377 = vpow2.f32 %v614_v11  ;;  %950 = vmax.xlane.f32.xlu0 %v3126_v63  ;;  %1254 = vrot.lane.b32.xlu1 %v2819_v15, %s2632_s24 }
 0x1b9   : > { %v569_v54 = vpop.xlane.xlu2 %568 }
 0x1ba   : > { %v586_v10 = vsub.f32 %v3058_v5, %v569_v54 }
 0x1bc   : > { %v3136_v14 = vpop.eup %2377  ;;  %v616_v35 = vmul.f32 1.442695, %v586_v10 }
 0x1bd   : > { %v658_v58 = vpack.c.bf16 %v3136_v14, %v3132_v56 }
 0x1be   : > { %2379 = vpow2.f32 %v616_v35 }
 0x1bf   : > { %746 = vmatmul.bf16.gmra.mxu1 %v658_v58 }
 0x1c1   : > { %v571_v34 = vpop.xlane.xlu0 %570 }
 0x1c2   : > { %v587_v21 = vsub.f32 %v3062_v3, %v571_v34  ;;  %v935_v29 = vpop.xlane.xlu2 %934 }
 0x1c3   : > { %v966_v32 = vsub.f32 %v3064_v7, %v935_v29  ;;  %v3155_v7 = vpop.f32.mrf.mxu2 }
 0x1c4   : > { %v618_v20 = vmul.f32 1.442695, %v587_v21  ;;  %v3147_v40 = vpop.eup %2379 }
 0x1c5   : > { %v982_v17 = vmul.f32 1.442695, %v966_v32 }
 0x1c6   : > { %2381 = vpow2.f32 %v618_v20 }
 0x1c7   : > { %2383 = vpow2.f32 %v982_v17 }
 0x1c8   : > { %v621_v22 = vpop.xlane.xlu1 %620 }
 0x1ca   : > { %1685 = vrot.lane.b32.xlu0 %v2783_v57, %s2633_s25  ;;  %v937_v5 = vpop.xlane.xlu0 %936 }
 0x1cb   : > { %v967_v25 = vsub.f32 %v3071_v8, %v937_v5  ;;  %v3164_v46 = vpop.f32.mrf.mxu2 }
 0x1cc   : > { %v3150_v1 = vpop.eup %2381 }
 0x1cd   : > { %v984_v3 = vmul.f32 1.442695, %v967_v25  ;;  %v659_v44 = vpack.c.bf16 %v3150_v1, %v3147_v40  ;;  %v3157_v2 = vpop.eup %2383 }
 0x1ce   : > { %952 = vmax.xlane.f32.xlu2 %v3134_v30 }
 0x1cf   : > { %2385 = vpow2.f32 %v984_v3  ;;  %751 = vmatmul.bf16.gmra.mxu1 %v659_v44 }
 0x1d0   : > { %v623_v57 = vpop.xlane.xlu2 %622  ;;  %2387 = vrcp.f32 %v621_v22 }
 0x1d1   : > { %2389 = vrcp.f32 %v623_v57 }
 0x1d2   : > { %v939_v38 = vpop.xlane.xlu1 %938 }
 0x1d3   : > { %v968_v8 = vsub.f32 %v3075_v33, %v939_v38  ;;  %v3171_v11 = vpop.f32.mrf.mxu2 }
 0x1d5   : > { %v3159_v52 = vpop.eup %2385  ;;  %v986_v19 = vmul.f32 1.442695, %v968_v8 }
 0x1d6   : > { %v1046_v24 = vpack.c.bf16 %v3159_v52, %v3157_v2  ;;  %v2388_v59 = vpop.eup %2387 }
 0x1d7   : > { %2391 = vpow2.f32 %v986_v19  ;;  %v2390_v33 = vpop.eup %2389 }
 0x1d8   : > { %1086 = vmatmul.bf16.vlgmr.msra.gmra.mxu3 %v1046_v24  ;;  %v625_v37 = vpop.xlane.xlu2 %624 }
 0x1da   : > { %v941_v53 = vpop.xlane.xlu0 %940 }
 0x1db   : > { %v969_v50 = vsub.f32 %v3080_v41, %v941_v53  ;;  %v3185_v22 = vpop.f32.mrf.mxu2 }
 0x1dc   : > { %v717_v49 = vpop.f32.mrf.mxu1 }
 0x1dd   : > { %v988_v0 = vmul.f32 1.442695, %v969_v50  ;;  %v773_v28 = vmul.f32 %v2388_v59, %v717_v49  ;;  %v3173_v10 = vpop.eup %2391 }
 0x1df   : > { %2393 = vpow2.f32 %v988_v0  ;;  %789 = vst.msk [vmem:[#allocation2] sm:$0xff] %vm442_vm0, %v773_v28  ;;  %2283 = vmatmul.msk.bf16.vlgmr.msrb.gmra.mxu1 %vm442_vm0, %v2943_v48 }
 0x1e0   : > { %954 = vmax.xlane.f32.xlu1 %v3142_v27  ;;  %2395 = vrcp.f32 %v625_v37 }
 0x1e2   : > { %v943_v54 = vpop.xlane.xlu2 %942 }
 0x1e3   : > { %v970_v34 = vsub.f32 %v3085_v61, %v943_v54  ;;  %v627_v29 = vpop.xlane.xlu0 %626  ;;  %v3200_v24 = vpop.f32.mrf.mxu2 }
 0x1e4   : > { %v719_v41 = vpop.f32.mrf.mxu1  ;;  %2397 = vrcp.f32 %v627_v29 }
 0x1e5   : > { %v3175_v58 = vpop.eup %2393  ;;  %v774_v35 = vmul.f32 %v2390_v33, %v719_v41  ;;  %v990_v21 = vmul.f32 1.442695, %v970_v34 }
 0x1e6   : > { %1687 = vrot.lane.b32.xlu2 %v2799_v4, %s2633_s25  ;;  %v1047_v48 = vpack.c.bf16 %v3175_v58, %v3173_v10  ;;  %v2396_v17 = vpop.eup %2395 }
 0x1e7   : > { %790 = vst.msk [vmem:[#allocation2 + $0x8] sm:$0xff] %vm442_vm0, %v774_v35  ;;  %2399 = vpow2.f32 %v990_v21 }
 0x1e8   : > { %960 = vmax.xlane.f32.xlu1 %v3171_v11  ;;  %1091 = vmatmul.bf16.gmra.mxu3 %v1047_v48 }
 0x1ea   : > { %v945_v20 = vpop.xlane.xlu1 %944  ;;  %v629_v25 = vpop.xlane.xlu2 %628 }
 0x1eb   : > { %v971_v32 = vsub.f32 %v3090_v9, %v945_v20  ;;  %v2398_v9 = vpop.eup %2397 }
 0x1ec   : > { %v722_v5 = vpop.f32.mrf.mxu1 }
 0x1ed   : > { %v992_v61 = vmul.f32 1.442695, %v971_v32  ;;  %v775_v4 = vmul.f32 %v2396_v17, %v722_v5  ;;  %v3193_v3 = vpop.eup %2399 }
 0x1ee   : > { %1689 = vrot.lane.b32.xlu2 %v2819_v15, %s2633_s25 }
 0x1ef   : > { %2401 = vpow2.f32 %v992_v61  ;;  %791 = vst.msk [vmem:[#allocation2 + $0x10] sm:$0xff] %vm442_vm0, %v775_v4  ;;  %2284 = vmatmul.msk.bf16.gmra.mxu1 %vm442_vm0, %v2989_v43 }
 0x1f0   : > { %962 = vmax.xlane.f32.xlu1 %v3185_v22  ;;  %2403 = vrcp.f32 %v629_v25 }
 0x1f2   : > { %v631_v43 = vpop.xlane.xlu1 %630 }
 0x1f3   : > { %2405 = vrcp.f32 %v631_v43 }
 0x1f4   : > { %956 = vmax.xlane.f32.xlu0 %v3155_v7  ;;  %v724_v44 = vpop.f32.mrf.mxu1 }
 0x1f5   : > { %v3196_v57 = vpop.eup %2401  ;;  %v776_v38 = vmul.f32 %v2398_v9, %v724_v44 }
 0x1f6   : > { %v1048_v15 = vpack.c.bf16 %v3196_v57, %v3193_v3  ;;  %v1682_v8 = vpop.permute.xlu0 %1681  ;;  %v2404_v53 = vpop.eup %2403 }
 0x1f7   : > { %792 = vst.msk [vmem:[#allocation2 + $0x18] sm:$0xff] %vm442_vm0, %v776_v38  ;;  %2294 = vmatmul.msk.bf16.gmra.mxu0 %vm442_vm0, %v1682_v8 }
 0x1f8   : > { %964 = vmax.xlane.f32.xlu1 %v3200_v24  ;;  %v633_v19 = vpop.xlane.xlu2 %632  ;;  %1096 = vmatmul.bf16.gmra.mxu3 %v1048_v15 }
 0x1f9   : > { %v2406_v0 = vpop.eup %2405  ;;  %2407 = vrcp.f32 %v633_v19 }
 0x1fc   : > { %v727_v37 = vpop.f32.mrf.mxu1 }
 0x1fd   : > { %v777_v50 = vmul.f32 %v2404_v53, %v727_v37 }
 0x1fe   : > { %v1253_v44 = vpop.permute.xlu0 %1252 }
 0x1ff   : > { %793 = vst.msk [vmem:[#allocation2 + $0x20] sm:$0xff] %vm442_vm0, %v777_v50  ;;  %2285 = vmatmul.msk.bf16.gmra.mxu1 %vm442_vm0, %v2997_v26  ;;  %v2408_v35 = vpop.eup %2407 }
 0x200   : > { %v635_v59 = vpop.xlane.xlu1 %634  ;;  %v949_v49 = vpop.xlane.xlu2 %948 }
 0x201   : > { %v973_v34 = vsub.f32 %v3103_v12, %v949_v49  ;;  %2409 = vrcp.f32 %v635_v59 }
 0x203   : > { %v996_v21 = vmul.f32 1.442695, %v973_v34 }
 0x204   : > { %v729_v28 = vpop.f32.mrf.mxu1 }
 0x205   : > { %v778_v33 = vmul.f32 %v2406_v0, %v729_v28  ;;  %2411 = vpow2.f32 %v996_v21 }
 0x207   : > { %794 = vst.msk [vmem:[#allocation2 + $0x28] sm:$0xff] %vm442_vm0, %v778_v33  ;;  %v2410_v12 = vpop.eup %2409 }
 0x208   : > { %v637_v54 = vpop.xlane.xlu1 %636  ;;  %v1684_v41 = vpop.permute.xlu2 %1683  ;;  %1503 = vrot.lane.b32.xlu0 %v2851_v36, %s2632_s24 }
 0x209   : > { %2295 = vmatmul.msk.bf16.gmra.mxu0 %vm442_vm0, %v1684_v41 }
 0x20c   : > { %v732_v48 = vpop.f32.mrf.mxu1 }
 0x20d   : > { %v779_v26 = vmul.f32 %v2408_v35, %v732_v48 }
 0x20f   : > { %795 = vst.msk [vmem:[#allocation2 + $0x30] sm:$0xff] %vm442_vm0, %v779_v26  ;;  %2286 = vmatmul.msk.bf16.gmra.mxu1 %vm442_vm0, %v3028_v42  ;;  %v3227_v42 = vpop.eup %2411 }
 0x210   : > { %v947_v29 = vpop.xlane.xlu1 %946  ;;  %1499 = vrot.lane.b32.xlu0 %v2873_v60, %s2632_s24 }
 0x211   : > { %v972_v20 = vsub.f32 %v3096_v23, %v947_v29  ;;  %1501 = vrot.lane.b32.xlu1 %v2858_v45, %s2632_s24 }
 0x213   : > { %v994_v32 = vmul.f32 1.442695, %v972_v20 }
 0x214   : > { %v734_v17 = vpop.f32.mrf.mxu1 }
 0x215   : > { %2413 = vpow2.f32 %v994_v32  ;;  %v780_v5 = vmul.f32 %v2410_v12, %v734_v17  ;;  %v3289_v32 = vpop.f32.mrf.mxu0 }
 0x216   : > { %2415 = vrcp.f32 %v637_v54 }
 0x217   : > { %796 = vst.msk [vmem:[#allocation2 + $0x38] sm:$0xff] %vm442_vm0, %v780_v5  ;;  %958 = vmax.xlane.f32.xlu2 %v3164_v46 }
 0x218   : > { %1497 = vrot.lane.b32.xlu0 %v2878_v62, %s2632_s24 }
 0x219   : > { %1936 = vrot.lane.b32.xlu1 %v2858_v45, %s2633_s25 }
 0x21b   : > { %v3229_v23 = vpop.eup %2413 }
 0x21c   : > { %v2416_v61 = vpop.eup %2415  ;;  %v737_v4 = vpop.f32.mrf.mxu1  ;;  %v1049_v25 = vpack.c.bf16 %v3227_v42, %v3229_v23 }
 0x21d   : > { %v781_v9 = vmul.f32 %v2416_v61, %v737_v4  ;;  %v3303_v61 = vpop.f32.mrf.mxu0 }
 0x21e   : > { %1101 = vmatmul.bf16.gmra.mxu3 %v1049_v25 }
 0x21f   : > { %797 = vst.msk [vmem:[#allocation2 + $0x40] sm:$0xff] %vm442_vm0, %v781_v9  ;;  %2287 = vmatmul.msk.bf16.gmra.mxu1 %vm442_vm0, %v3039_v47 }
 0x220   : > { %1938 = vrot.lane.b32.xlu0 %v2851_v36, %s2633_s25 }
 0x224   : > { %v3238_v45 = vpop.f32.mrf.mxu1 }
 0x228   : > { %1934 = vrot.lane.b32.xlu0 %v2873_v60, %s2633_s25  ;;  %v1255_v49 = vpop.permute.xlu1 %1254 }
 0x229   : > { %v951_v47 = vpop.xlane.xlu0 %950 }
 0x22a   : > { %v974_v8 = vsub.f32 %v3126_v63, %v951_v47 }
 0x22c   : > { %v3242_v38 = vpop.f32.mrf.mxu1 }
 0x22d   : > { %3880 = vst [vmem:[#allocation3_spill] sm:$0xff] %v3242_v38 }
 0x22f   : > { %1495 = vrot.lane.b32.xlu2 %v2845_v31, %s2632_s24  ;;  %2288 = vmatmul.msk.bf16.gmra.mxu1 %vm442_vm0, %v3068_v6  ;;  %v998_v6 = vmul.f32 1.442695, %v974_v8 }
 0x230   : > { %1932 = vrot.lane.b32.xlu0 %v2878_v62, %s2633_s25 }
 0x231   : > { %2417 = vpow2.f32 %v998_v6 }
 0x234   : > { %v3250_v15 = vpop.f32.mrf.mxu1 }
 0x237   : > { %1493 = vrot.lane.b32.xlu2 %v2865_v55, %s2632_s24  ;;  %v3266_v63 = vpop.eup %2417 }
 0x23c   : > { %v1686_v36 = vpop.permute.xlu0 %1685  ;;  %v3254_v60 = vpop.f32.mrf.mxu1 }
 0x23d   : > { %2296 = vmatmul.msk.bf16.gmra.mxu0 %vm442_vm0, %v1686_v36 }
 0x23f   : > { %1491 = vrot.lane.b32.xlu2 %v2899_v13, %s2632_s24  ;;  %2289 = vmatmul.msk.bf16.gmra.mxu1 %vm442_vm0, %v1253_v44 }
 0x241   : > { %v953_v62 = vpop.xlane.xlu2 %952 }
 0x242   : > { %v975_v43 = vsub.f32 %v3134_v30, %v953_v62 }
 0x244   : > { %v1000_v19 = vmul.f32 1.442695, %v975_v43  ;;  %v3262_v53 = vpop.f32.mrf.mxu1 }
 0x245   : > { %3881 = vst [vmem:[#allocation4_spill] sm:$0xff] %v3262_v53 }
 0x246   : > { %2419 = vpow2.f32 %v1000_v19 }
 0x247   : > { %1489 = vrot.lane.b32.xlu2 %v2905_v16, %s2632_s24 }
 0x249   : > { %v1688_v50 = vpop.permute.xlu2 %1687 }
 0x24c   : > { %v3268_v37 = vpop.eup %2419  ;;  %v3270_v59 = vpop.f32.mrf.mxu1 }
 0x24d   : > { %3882 = vst [vmem:[#allocation5_spill] sm:$0xff] %v3270_v59  ;;  %2297 = vmatmul.msk.bf16.gmra.mxu0 %vm442_vm0, %v1688_v50  ;;  %v1050_v30 = vpack.c.bf16 %v3268_v37, %v3266_v63 }
 0x24f   : > { %1106 = vmatmul.bf16.gmra.mxu3 %v1050_v30  ;;  %2290 = vmatmul.msk.bf16.gmra.mxu1 %vm442_vm0, %v1255_v49 }
 0x251   : > { %v1690_v54 = vpop.permute.xlu2 %1689 }
 0x253   : > { %v955_v33 = vpop.xlane.xlu1 %954 }
 0x254   : > { %v3276_v0 = vpop.f32.mrf.mxu1  ;;  %v976_v41 = vsub.f32 %v3142_v27, %v955_v33 }
 0x255   : > { %3883 = vst [vmem:[#allocation6_spill] sm:$0xff] %v3276_v0 }
 0x256   : > { %v1002_v34 = vmul.f32 1.442695, %v976_v41 }
 0x258   : > { %2421 = vpow2.f32 %v1002_v34 }
 0x25b   : > { %v961_v48 = vpop.xlane.xlu1 %960 }
 0x25c   : > { %v3278_v28 = vpop.f32.mrf.mxu1  ;;  %v979_v8 = vsub.f32 %v3171_v11, %v961_v48 }
 0x25d   : > { %1369 = vmax.xlane.f32.xlu0 %v3278_v28 }
 0x25e   : > { %v3292_v12 = vpop.eup %2421  ;;  %v1008_v6 = vmul.f32 1.442695, %v979_v8 }
 0x25f   : > { %2298 = vmatmul.msk.bf16.vlgmr.msra.gmra.mxu1 %vm442_vm0, %v1690_v54 }
 0x263   : > { %v963_v27 = vpop.xlane.xlu1 %962 }
 0x264   : > { %v3283_v35 = vpop.f32.mrf.mxu1 }
 0x265   : > { %1371 = vmax.xlane.f32.xlu1 %v3283_v35 }
 0x267   : > { %v957_v26 = vpop.xlane.xlu0 %956 }
 0x268   : > { %v977_v21 = vsub.f32 %v3155_v7, %v957_v26 }
 0x26a   : > { %v1004_v29 = vmul.f32 1.442695, %v977_v21 }
 0x26b   : > { %v965_v25 = vpop.xlane.xlu1 %964 }
 0x26c   : > { %2423 = vpow2.f32 %v1004_v29  ;;  %v3287_v20 = vpop.f32.mrf.mxu1  ;;  %v980_v29 = vsub.f32 %v3185_v22, %v963_v27 }
 0x26d   : > { %2425 = vpow2.f32 %v1008_v6 }
 0x270   : > { %1373 = vmax.xlane.f32.xlu2 %v3287_v20 }
 0x271   : > { %1930 = vrot.lane.b32.xlu0 %v2845_v31, %s2633_s25  ;;  %v3309_v31 = vpop.f32.mrf.mxu0 }
 0x272   : > { %v3296_v17 = vpop.eup %2423 }
 0x273   : > { %v1051_v7 = vpack.c.bf16 %v3296_v17, %v3292_v12  ;;  %v3320_v41 = vpop.eup %2425 }
 0x274   : > { %v3300_v5 = vpop.f32.mrf.mxu1 }
 0x275   : > { %1111 = vmatmul.bf16.gmra.mxu3 %v1051_v7  ;;  %1375 = vmax.xlane.f32.xlu1 %v3300_v5 }
 0x278   : > { %1806 = vmax.xlane.f32.xlu2 %v3303_v61 }
 0x279   : > { %v3315_v19 = vpop.f32.mrf.mxu0 }
 0x27a   : > { %v1504_v4 = vpop.permute.xlu0 %1503 }
 0x27b   : > { %1513 = vmatpush.bf16.msrb.mxu3 %v1504_v4 }
 0x27c   : > { %v3306_v9 = vpop.f32.mrf.mxu1 }
 0x27d   : > { %1377 = vmax.xlane.f32.xlu1 %v3306_v9 }
 0x281   : > { %v3326_v26 = vpop.f32.mrf.mxu0 }
 0x282   : > { %v1500_v44 = vpop.permute.xlu0 %1499 }
 0x283   : > { %v1502_v47 = vpop.permute.xlu1 %1501 }
 0x284   : > { %v3311_v36 = vpop.f32.mrf.mxu1  ;;  %1514 = vmatpush.bf16.msrb.mxu3 %v1502_v47  ;;  %v1010_v47 = vmul.f32 1.442695, %v980_v29 }
 0x285   : > { %1379 = vmax.xlane.f32.xlu2 %v3311_v36 }
 0x288   : > { %1515 = vmatpush.bf16.msrb.mxu3 %v1500_v44 }
 0x28a   : > { %v959_v62 = vpop.xlane.xlu2 %958  ;;  %v1498_v43 = vpop.permute.xlu0 %1497 }
 0x28b   : > { %v978_v50 = vsub.f32 %v3164_v46, %v959_v62  ;;  %v1937_v34 = vpop.permute.xlu1 %1936  ;;  %v981_v46 = vsub.f32 %v3200_v24, %v965_v25 }
 0x28c   : > { %v3318_v30 = vpop.f32.mrf.mxu1  ;;  %1516 = vmatpush.bf16.msrb.mxu3 %v1498_v43 }
 0x28d   : > { %v1006_v49 = vmul.f32 1.442695, %v978_v50  ;;  %v1012_v7 = vmul.f32 1.442695, %v981_v46 }
 0x28f   : > { %2427 = vpow2.f32 %v1006_v49 }
 0x290   : > { %2429 = vpow2.f32 %v1012_v7 }
 0x291   : > { %2431 = vpow2.f32 %v1010_v47 }
 0x292   : > { %v1496_v33 = vpop.permute.xlu2 %1495  ;;  %v1939_v54 = vpop.permute.xlu0 %1938 }
 0x293   : > { %1517 = vmatpush.bf16.msrb.mxu3 %v1496_v33  ;;  %1948 = vmatpush.bf16.msrb.mxu2 %v1939_v54 }
 0x294   : > { %v3322_v11 = vpop.f32.mrf.mxu1 }
 0x295   : > { %v3324_v48 = vpop.eup %2427 }
 0x296   : > { %1926 = vrot.lane.b32.xlu1 %v2899_v13, %s2633_s25  ;;  %v1052_v21 = vpack.c.bf16 %v3320_v41, %v3324_v48  ;;  %v3339_v13 = vpop.f32.mrf.mxu0  ;;  %v3341_v27 = vpop.eup %2429 }
 0x297   : > { %1949 = vmatpush.bf16.msrb.mxu2 %v1937_v34  ;;  %v3346_v6 = vpop.eup %2431 }
 0x298   : > { %1116 = vmatmul.bf16.gmra.mxu3 %v1052_v21 }
 0x29a   : > { %v1494_v4 = vpop.permute.xlu2 %1493  ;;  %v1935_v44 = vpop.permute.xlu0 %1934 }
 0x29b   : > { %1518 = vmatpush.bf16.msrb.mxu3 %v1494_v4  ;;  %1804 = vmax.xlane.f32.xlu0 %v3289_v32 }
 0x29c   : > { %v3335_v8 = vpop.f32.mrf.mxu1  ;;  %1950 = vmatpush.bf16.msrb.mxu2 %v1935_v44 }
 0x29d   : > { %1928 = vrot.lane.b32.xlu2 %v2865_v55, %s2633_s25  ;;  %v1053_v55 = vpack.c.bf16 %v3341_v27, %v3346_v6 }
 0x29e   : > { %v3352_v62 = vpop.f32.mrf.mxu0 }
 0x2a2   : > { %v1492_v22 = vpop.permute.xlu2 %1491  ;;  %v1933_v24 = vpop.permute.xlu0 %1932 }
 0x2a3   : > { %1519 = vmatpush.bf16.msrb.mxu3 %v1492_v22  ;;  %1381 = vmax.xlane.f32.xlu0 %v3318_v30 }
 0x2a4   : > { %v3344_v25 = vpop.f32.mrf.mxu1  ;;  %1951 = vmatpush.bf16.msrb.mxu2 %v1933_v24 }
 0x2a5   : > { %1924 = vrot.lane.b32.xlu2 %v2905_v16, %s2633_s25 }
 0x2a6   : > { %v3357_v49 = vpop.f32.mrf.mxu0 }
 0x2a8   : > { %1121 = vmatmul.bf16.gmra.mxu3 %v1053_v55 }
 0x2aa   : > { %v1490_v43 = vpop.permute.xlu2 %1489 }
 0x2ab   : > { %1520 = vmatpush.bf16.msrb.mxu3 %v1490_v43  ;;  %1808 = vmax.xlane.f32.xlu0 %v3309_v31 }
 0x2ac   : > { %v3355_v50 = vpop.f32.mrf.mxu1 }
 0x2ae   : > { %v3362_v16 = vpop.f32.mrf.mxu0 }
 0x2af   : > { %2313 = vmatpush.bf16.msra.mxu3 %v1939_v54 }
 0x2b3   : > { %2314 = vmatpush.bf16.msra.mxu3 %v1937_v34  ;;  %1810 = vmax.xlane.f32.xlu0 %v3315_v19 }
 0x2b4   : > { %v3360_v33 = vpop.f32.mrf.mxu1 }
 0x2b6   : > { %v3371_v34 = vpop.f32.mrf.mxu0 }
 0x2b7   : > { %2315 = vmatpush.bf16.msra.mxu3 %v1935_v44 }
 0x2bb   : > { %2316 = vmatpush.bf16.msra.mxu3 %v1933_v24  ;;  %1387 = vmax.xlane.f32.xlu0 %v3344_v25 }
 0x2bc   : > { %v3365_v46 = vpop.f32.mrf.mxu1 }
 0x2be   : > { %v3377_v29 = vpop.f32.mrf.mxu0 }
 0x2c0   : > { %1385 = vmax.xlane.f32.xlu1 %v3335_v8 }
 0x2c3   : > { %1812 = vmax.xlane.f32.xlu0 %v3326_v26 }
 0x2c4   : > { %v3369_v54 = vpop.f32.mrf.mxu1 }
 0x2c6   : > { %v3386_v47 = vpop.f32.mrf.mxu0 }
 0x2c8   : > { %1395 = vmax.xlane.f32.xlu1 %v3369_v54 }
 0x2cb   : > { %1814 = vmax.xlane.f32.xlu0 %v3339_v13 }
 0x2cc   : > { %v3375_v21 = vpop.f32.mrf.mxu1 }
 0x2ce   : > { %1383 = vmax.xlane.f32.xlu2 %v3322_v11 }
 0x2d0   : > { %1397 = vmax.xlane.f32.xlu1 %v3375_v21  ;;  %v1370_v7 = vpop.xlane.xlu0 %1369 }
 0x2d1   : > { %v1401_v4 = vsub.f32 %v3278_v28, %v1370_v7 }
 0x2d3   : > { %1391 = vmax.xlane.f32.xlu0 %v3360_v33  ;;  %v1417_v22 = vmul.f32 1.442695, %v1401_v4 }
 0x2d4   : > { %v3383_v44 = vpop.f32.mrf.mxu1 }
 0x2d5   : > { %2433 = vpow2.f32 %v1417_v22 }
 0x2d6   : > { %1389 = vmax.xlane.f32.xlu2 %v3355_v50 }
 0x2d8   : > { %v1372_v24 = vpop.xlane.xlu1 %1371  ;;  %1826 = vmax.xlane.f32.xlu1 %v3386_v47 }
 0x2d9   : > { %v1402_v55 = vsub.f32 %v3283_v35, %v1372_v24 }
 0x2db   : > { %v1419_v43 = vmul.f32 1.442695, %v1402_v55  ;;  %1818 = vmax.xlane.f32.xlu0 %v3357_v49  ;;  %v3395_v7 = vpop.eup %2433 }
 0x2dc   : > { %v3392_v28 = vpop.f32.mrf.mxu1 }
 0x2dd   : > { %2435 = vpow2.f32 %v1419_v43 }
 0x2de   : > { %1816 = vmax.xlane.f32.xlu2 %v3352_v62 }
 0x2e0   : > { %1832 = vmax.xlane.f32.xlu1 %v3392_v28 }
 0x2e3   : > { %v3397_v53 = vpop.eup %2435  ;;  %v1374_v4 = vpop.xlane.xlu2 %1373  ;;  %1820 = vmax.xlane.f32.xlu0 %v3362_v16 }
 0x2e4   : > { %v1931_v59 = vpop.permute.xlu0 %1930  ;;  %v1403_v35 = vsub.f32 %v3287_v20, %v1374_v4  ;;  %v1481_v22 = vpack.c.bf16 %v3397_v53, %v3395_v7 }
 0x2e5   : > { %1952 = vmatpush.bf16.msrb.mxu2 %v1931_v59  ;;  %2317 = vmatpush.bf16.msra.mxu3 %v1931_v59 }
 0x2e6   : > { %1521 = vmatmul.bf16.vlgmr.msrb.gmra.mxu3 %v1481_v22  ;;  %1393 = vmax.xlane.f32.xlu2 %v3365_v46  ;;  %v1421_v24 = vmul.f32 1.442695, %v1403_v35  ;;  %v3411_v22 = vpop.f32.mrf.mxu0 }
 0x2e8   : > { %v1376_v55 = vpop.xlane.xlu1 %1375  ;;  %1016 = vadd.xlane.f32.xlu1 %v3159_v52  ;;  %2437 = vpow2.f32 %v1421_v24 }
 0x2e9   : > { %v1404_v43 = vsub.f32 %v3300_v5, %v1376_v55  ;;  %v3419_v55 = vpop.f32.mrf.mxu1 }
 0x2eb   : > { %v1423_v38 = vmul.f32 1.442695, %v1404_v43  ;;  %1399 = vmax.xlane.f32.xlu0 %v3383_v44  ;;  %v1807_v20 = vpop.xlane.xlu2 %1806 }
 0x2ed   : > { %2439 = vpow2.f32 %v1423_v38 }
 0x2ee   : > { %1822 = vmax.xlane.f32.xlu2 %v3371_v34  ;;  %v3409_v4 = vpop.eup %2437  ;;  %v3422_v0 = vpop.f32.mrf.mxu0 }
 0x2f0   : > { %1022 = vadd.xlane.f32.xlu1 %v3193_v3  ;;  %v1378_v59 = vpop.xlane.xlu1 %1377 }
 0x2f1   : > { %v1405_v52 = vsub.f32 %v3306_v9, %v1378_v59  ;;  %v3426_v59 = vpop.f32.mrf.mxu3 }
 0x2f3   : > { %v2440_v35 = vpop.eup %2439  ;;  %1828 = vmax.xlane.f32.xlu0 %v3411_v22  ;;  %v1425_v38 = vmul.f32 1.442695, %v1405_v52 }
 0x2f4   : > { %v1482_v5 = vpack.c.bf16 %v2440_v35, %v3409_v4 }
 0x2f5   : > { %2441 = vpow2.f32 %v1425_v38 }
 0x2f6   : > { %1526 = vmatmul.bf16.gmra.mxu3 %v1482_v5  ;;  %1824 = vmax.xlane.f32.xlu2 %v3377_v29 }
 0x2f8   : > { %v1380_v24 = vpop.xlane.xlu2 %1379  ;;  %1028 = vadd.xlane.f32.xlu1 %v3227_v42 }
 0x2f9   : > { %v1406_v3 = vsub.f32 %v3311_v36, %v1380_v24  ;;  %v3435_v38 = vpop.f32.mrf.mxu3 }
 0x2fb   : > { %v1427_v43 = vmul.f32 1.442695, %v1406_v3  ;;  %1834 = vmax.xlane.f32.xlu0 %v3419_v55  ;;  %v2442_v42 = vpop.eup %2441 }
 0x2fd   : > { %2443 = vpow2.f32 %v1427_v43 }
 0x2fe   : > { %1830 = vmax.xlane.f32.xlu2 %v3422_v0 }
 0x300   : > { %v1929_v9 = vpop.permute.xlu2 %1928  ;;  %1034 = vadd.xlane.f32.xlu1 %v3292_v12  ;;  %v1837_v12 = vsub.f32 %v3303_v61, %v1807_v20 }
 0x301   : > { %1953 = vmatpush.bf16.msrb.mxu2 %v1929_v9  ;;  %2318 = vmatpush.bf16.msra.mxu3 %v1929_v9  ;;  %v3442_v61 = vpop.f32.mrf.mxu3 }
 0x303   : > { %v3428_v36 = vpop.eup %2443  ;;  %1018 = vadd.xlane.f32.xlu0 %v3173_v10  ;;  %v1854_v10 = vmul.f32 1.442695, %v1837_v12 }
 0x304   : > { %v1483_v52 = vpack.c.bf16 %v3428_v36, %v2442_v42 }
 0x305   : > { %2445 = vpow2.f32 %v1854_v10 }
 0x306   : > { %1531 = vmatmul.bf16.gmra.mxu3 %v1483_v52  ;;  %1014 = vadd.xlane.f32.xlu2 %v3157_v2 }
 0x308   : > { %v1927_v5 = vpop.permute.xlu1 %1926  ;;  %1040 = vadd.xlane.f32.xlu1 %v3320_v41  ;;  %v1925_v24 = vpop.permute.xlu2 %1924 }
 0x309   : > { %1954 = vmatpush.bf16.msrb.mxu2 %v1927_v5  ;;  %2319 = vmatpush.bf16.msra.mxu3 %v1927_v5  ;;  %v3454_v9 = vpop.f32.mrf.mxu3 }
 0x30b   : > { %1024 = vadd.xlane.f32.xlu0 %v3196_v57  ;;  %v3446_v43 = vpop.eup %2445 }
 0x30d   : > { %1955 = vmatpush.bf16.msrb.mxu2 %v1925_v24  ;;  %2320 = vmatpush.bf16.msra.mxu3 %v1925_v24 }
 0x30e   : > { %v1805_v3 = vpop.xlane.xlu0 %1804  ;;  %1020 = vadd.xlane.f32.xlu2 %v3175_v58 }
 0x30f   : > { %v1836_v2 = vsub.f32 %v3289_v32, %v1805_v3 }
 0x310   : > { %1449 = vadd.xlane.f32.xlu1 %v3395_v7 }
 0x311   : > { %v1852_v41 = vmul.f32 1.442695, %v1836_v2  ;;  %v3463_v5 = vpop.f32.mrf.mxu3 }
 0x313   : > { %2447 = vpow2.f32 %v1852_v41  ;;  %1030 = vadd.xlane.f32.xlu0 %v3266_v63 }
 0x316   : > { %v1382_v20 = vpop.xlane.xlu0 %1381  ;;  %1026 = vadd.xlane.f32.xlu2 %v3229_v23 }
 0x317   : > { %v1407_v57 = vsub.f32 %v3318_v30, %v1382_v20 }
 0x318   : > { %1455 = vadd.xlane.f32.xlu1 %v2440_v35 }
 0x319   : > { %v3448_v58 = vpop.eup %2447  ;;  %v1429_v32 = vmul.f32 1.442695, %v1407_v57 }
 0x31a   : > { %v1916_v7 = vpack.c.bf16 %v3446_v43, %v3448_v58 }
 0x31b   : > { %2449 = vpow2.f32 %v1429_v32  ;;  %1036 = vadd.xlane.f32.xlu0 %v3296_v17 }
 0x31c   : > { %1956 = vmatmul.bf16.vlgmr.msrb.gmra.mxu2 %v1916_v7 }
 0x31e   : > { %v1809_v63 = vpop.xlane.xlu0 %1808  ;;  %1032 = vadd.xlane.f32.xlu2 %v3268_v37 }
 0x31f   : > { %v1838_v30 = vsub.f32 %v3309_v31, %v1809_v63 }
 0x321   : > { %v3456_v23 = vpop.eup %2449  ;;  %v1856_v35 = vmul.f32 1.442695, %v1838_v30 }
 0x322   : > { %1461 = vadd.xlane.f32.xlu1 %v3456_v23 }
 0x323   : > { %1042 = vadd.xlane.f32.xlu0 %v3346_v6  ;;  %2451 = vpow2.f32 %v1856_v35 }
 0x326   : > { %v1811_v52 = vpop.xlane.xlu0 %1810  ;;  %1038 = vadd.xlane.f32.xlu2 %v3324_v48  ;;  %v3474_v48 = vpop.f32.mrf.mxu3 }
 0x327   : > { %v1839_v17 = vsub.f32 %v3315_v19, %v1811_v52 }
 0x329   : > { %v1858_v12 = vmul.f32 1.442695, %v1839_v17  ;;  %v3468_v24 = vpop.eup %2451 }
 0x32b   : > { %2453 = vpow2.f32 %v1858_v12  ;;  %1451 = vadd.xlane.f32.xlu0 %v3397_v53 }
 0x32e   : > { %v1388_v37 = vpop.xlane.xlu0 %1387  ;;  %1044 = vadd.xlane.f32.xlu2 %v3341_v27  ;;  %v3482_v41 = vpop.f32.mrf.mxu3 }
 0x32f   : > { %v1410_v31 = vsub.f32 %v3344_v25, %v1388_v37 }
 0x331   : > { %v3470_v6 = vpop.eup %2453  ;;  %v1435_v10 = vmul.f32 1.442695, %v1410_v31 }
 0x332   : > { %v1917_v19 = vpack.c.bf16 %v3470_v6, %v3468_v24 }
 0x333   : > { %2455 = vpow2.f32 %v1435_v10  ;;  %1457 = vadd.xlane.f32.xlu0 %v2442_v42  ;;  %v1386_v3 = vpop.xlane.xlu1 %1385 }
 0x334   : > { %1961 = vmatmul.bf16.gmra.mxu2 %v1917_v19  ;;  %v1409_v27 = vsub.f32 %v3335_v8, %v1386_v3 }
 0x336   : > { %v1813_v53 = vpop.xlane.xlu0 %1812  ;;  %1453 = vadd.xlane.f32.xlu2 %v3409_v4  ;;  %v1433_v20 = vmul.f32 1.442695, %v1409_v27  ;;  %v3487_v30 = vpop.f32.mrf.mxu3 }
 0x337   : > { %v1840_v2 = vsub.f32 %v3326_v26, %v1813_v53 }
 0x338   : > { %2457 = vpow2.f32 %v1433_v20 }
 0x339   : > { %v3478_v25 = vpop.eup %2455  ;;  %v1860_v57 = vmul.f32 1.442695, %v1840_v2 }
 0x33a   : > { %1467 = vadd.xlane.f32.xlu1 %v3478_v25 }
 0x33b   : > { %2459 = vpow2.f32 %v1860_v57  ;;  %v1396_v35 = vpop.xlane.xlu1 %1395 }
 0x33c   : > { %v1414_v19 = vsub.f32 %v3369_v54, %v1396_v35 }
 0x33e   : > { %v1815_v32 = vpop.xlane.xlu0 %1814  ;;  %1459 = vadd.xlane.f32.xlu2 %v3428_v36  ;;  %v2458_v26 = vpop.eup %2457 }
 0x33f   : > { %v1841_v42 = vsub.f32 %v3339_v13, %v1815_v32  ;;  %v3498_v53 = vpop.f32.mrf.mxu3 }
 0x341   : > { %v1862_v7 = vmul.f32 1.442695, %v1841_v42  ;;  %v1384_v4 = vpop.xlane.xlu2 %1383  ;;  %v3490_v36 = vpop.eup %2459 }
 0x342   : > { %v1408_v8 = vsub.f32 %v3322_v11, %v1384_v4 }
 0x343   : > { %2461 = vpow2.f32 %v1862_v7  ;;  %v1398_v20 = vpop.xlane.xlu1 %1397 }
 0x344   : > { %v1431_v63 = vmul.f32 1.442695, %v1408_v8  ;;  %v1415_v54 = vsub.f32 %v3375_v21, %v1398_v20 }
 0x346   : > { %2463 = vpow2.f32 %v1431_v63  ;;  %v1392_v52 = vpop.xlane.xlu0 %1391  ;;  %1465 = vadd.xlane.f32.xlu2 %v2458_v26 }
 0x347   : > { %v1412_v17 = vsub.f32 %v3360_v33, %v1392_v52  ;;  %v3504_v63 = vpop.f32.mrf.mxu3 }
 0x349   : > { %v3492_v12 = vpop.eup %2461  ;;  %v1439_v13 = vmul.f32 1.442695, %v1412_v17  ;;  %v1390_v37 = vpop.xlane.xlu2 %1389 }
 0x34a   : > { %v1411_v31 = vsub.f32 %v3355_v50, %v1390_v37  ;;  %v1918_v11 = vpack.c.bf16 %v3492_v12, %v3490_v36  ;;  %v1443_v50 = vmul.f32 1.442695, %v1414_v19 }
 0x34b   : > { %2465 = vpow2.f32 %v1439_v13 }
 0x34c   : > { %v2464_v10 = vpop.eup %2463  ;;  %v1437_v3 = vmul.f32 1.442695, %v1411_v31  ;;  %1966 = vmatmul.bf16.gmra.mxu2 %v1918_v11  ;;  %v1485_v31 = vpack.c.bf16 %v3478_v25, %v2458_v26 }
 0x34d   : > { %1463 = vadd.xlane.f32.xlu0 %v2464_v10  ;;  %v1484_v33 = vpack.c.bf16 %v2464_v10, %v3456_v23 }
 0x34e   : > { %2467 = vpow2.f32 %v1437_v3  ;;  %v1819_v27 = vpop.xlane.xlu0 %1818 }
 0x34f   : > { %v1843_v2 = vsub.f32 %v3357_v49, %v1819_v27  ;;  %1536 = vmatmul.bf16.gmra.mxu3 %v1484_v33  ;;  %2469 = vpow2.f32 %v1443_v50  ;;  %v1445_v49 = vmul.f32 1.442695, %v1415_v54  ;;  %v3513_v19 = vpop.f32.mrf.mxu3  ;;  %v1827_v50 = vpop.xlane.xlu1 %1826 }
 0x351   : > { %v2466_v57 = vpop.eup %2465  ;;  %v1866_v32 = vmul.f32 1.442695, %v1843_v2  ;;  %v1817_v42 = vpop.xlane.xlu2 %1816 }
 0x352   : > { %v1842_v7 = vsub.f32 %v3352_v62, %v1817_v42  ;;  %1471 = vadd.xlane.f32.xlu2 %v2466_v57  ;;  %v1847_v42 = vsub.f32 %v3386_v47, %v1827_v50 }
 0x353   : > { %2471 = vpow2.f32 %v1866_v32 }
 0x354   : > { %v2468_v4 = vpop.eup %2467  ;;  %v1864_v8 = vmul.f32 1.442695, %v1842_v7 }
 0x355   : > { %1469 = vadd.xlane.f32.xlu0 %v2468_v4  ;;  %v3506_v52 = vpop.eup %2469  ;;  %v1486_v7 = vpack.c.bf16 %v2466_v57, %v2468_v4 }
 0x356   : > { %2473 = vpow2.f32 %v1864_v8  ;;  %v1821_v23 = vpop.xlane.xlu0 %1820 }
 0x357   : > { %2475 = vpow2.f32 %v1445_v49  ;;  %v1844_v37 = vsub.f32 %v3362_v16, %v1821_v23  ;;  %v3520_v26 = vpop.f32.mrf.mxu3  ;;  %v1833_v4 = vpop.xlane.xlu1 %1832 }
 0x359   : > { %v1394_v35 = vpop.xlane.xlu2 %1393  ;;  %v2472_v62 = vpop.eup %2471 }
 0x35a   : > { %v1413_v17 = vsub.f32 %v3365_v46, %v1394_v35  ;;  %1886 = vadd.xlane.f32.xlu2 %v3446_v43  ;;  %v1868_v43 = vmul.f32 1.442695, %v1844_v37 }
 0x35c   : > { %v2474_v21 = vpop.eup %2473  ;;  %v1441_v13 = vmul.f32 1.442695, %v1413_v17 }
 0x35d   : > { %1475 = vadd.xlane.f32.xlu0 %v3506_v52  ;;  %v1919_v11 = vpack.c.bf16 %v2472_v62, %v2474_v21  ;;  %v3515_v46 = vpop.eup %2475 }
 0x35e   : > { %2477 = vpow2.f32 %v1441_v13  ;;  %v1400_v10 = vpop.xlane.xlu0 %1399 }
 0x35f   : > { %1541 = vmatmul.bf16.gmra.mxu3 %v1485_v31  ;;  %1971 = vmatmul.bf16.gmra.mxu2 %v1919_v11  ;;  %2479 = vpow2.f32 %v1868_v43  ;;  %v1416_v54 = vsub.f32 %v3383_v44, %v1400_v10  ;;  %v3528_v23 = vpop.f32.mrf.mxu3 }
 0x361   : > { %v1823_v3 = vpop.xlane.xlu2 %1822  ;;  %v1447_v35 = vmul.f32 1.442695, %v1416_v54 }
 0x362   : > { %v1845_v33 = vsub.f32 %v3371_v34, %v1823_v3  ;;  %1477 = vadd.xlane.f32.xlu2 %v3515_v46  ;;  %v1017_v3 = vpop.xlane.xlu1 %1016 }
 0x364   : > { %v2478_v16 = vpop.eup %2477  ;;  %v1870_v27 = vmul.f32 1.442695, %v1845_v33 }
 0x365   : > { %1473 = vadd.xlane.f32.xlu1 %v2478_v16  ;;  %1884 = vadd.xlane.f32.xlu0 %v3448_v58  ;;  %v2480_v20 = vpop.eup %2479 }
 0x366   : > { %2481 = vpow2.f32 %v1870_v27  ;;  %v1829_v25 = vpop.xlane.xlu0 %1828  ;;  %v1850_v27 = vsub.f32 %v3392_v28, %v1833_v4 }
 0x367   : > { %v1848_v44 = vsub.f32 %v3411_v22, %v1829_v25  ;;  %v3535_v37 = vpop.f32.mrf.mxu3 }
 0x368   : > { %v1880_v25 = vmul.f32 1.442695, %v1850_v27 }
 0x369   : > { %v1825_v2 = vpop.xlane.xlu2 %1824  ;;  %v1876_v17 = vmul.f32 1.442695, %v1848_v44 }
 0x36a   : > { %1892 = vadd.xlane.f32.xlu2 %v3490_v36  ;;  %v1846_v32 = vsub.f32 %v3377_v29, %v1825_v2  ;;  %v1874_v36 = vmul.f32 1.442695, %v1847_v42 }
 0x36c   : > { %v2482_v34 = vpop.eup %2481  ;;  %v1872_v8 = vmul.f32 1.442695, %v1846_v32  ;;  %v1023_v32 = vpop.xlane.xlu1 %1022 }
 0x36d   : > { %1888 = vadd.xlane.f32.xlu1 %v3468_v24  ;;  %1890 = vadd.xlane.f32.xlu0 %v3470_v6  ;;  %v1920_v58 = vpack.c.bf16 %v2482_v34, %v2480_v20 }
 0x36e   : > { %v1835_v29 = vpop.xlane.xlu0 %1834  ;;  %2483 = vpow2.f32 %v1872_v8 }
 0x36f   : > { %1546 = vmatmul.bf16.gmra.mxu3 %v1486_v7  ;;  %1976 = vmatmul.bf16.gmra.mxu2 %v1920_v58  ;;  %2485 = vpow2.f32 %v1874_v36  ;;  %v1851_v22 = vsub.f32 %v3419_v55, %v1835_v29  ;;  %v3539_v33 = vpop.f32.mrf.mxu3 }
 0x370   : > { %2487 = vpow2.f32 %v1447_v35 }
 0x371   : > { %v1831_v49 = vpop.xlane.xlu2 %1830  ;;  %v1882_v10 = vmul.f32 1.442695, %v1851_v22 }
 0x372   : > { %1898 = vadd.xlane.f32.xlu2 %v2472_v62  ;;  %v1849_v47 = vsub.f32 %v3422_v0, %v1831_v49 }
 0x374   : > { %v1878_v24 = vmul.f32 1.442695, %v1849_v47  ;;  %v2484_v6 = vpop.eup %2483  ;;  %v1029_v7 = vpop.xlane.xlu1 %1028 }
 0x375   : > { %1894 = vadd.xlane.f32.xlu1 %v3492_v12  ;;  %1896 = vadd.xlane.f32.xlu0 %v2474_v21  ;;  %v2486_v13 = vpop.eup %2485  ;;  %v1487_v12 = vpack.c.bf16 %v3506_v52, %v2478_v16 }
 0x376   : > { %2489 = vpow2.f32 %v1878_v24  ;;  %v2488_v62 = vpop.eup %2487  ;;  %v1019_v0 = vpop.xlane.xlu0 %1018  ;;  %v1921_v21 = vpack.c.bf16 %v2486_v13, %v2484_v6 }
 0x377   : > { %2491 = vpow2.f32 %v1876_v17  ;;  %v1488_v2 = vpack.c.bf16 %v2488_v62, %v3515_v46 }
 0x378   : > { %2493 = vpow2.f32 %v1882_v10 }
 0x379   : > { %v3533_v57 = vpop.xlane.xlu2 %1014  ;;  %2495 = vpow2.f32 %v1880_v25 }
 0x37a   : > { %1904 = vadd.xlane.f32.xlu2 %v2484_v6  ;;  %2497 = vrcp.f32 %v1017_v3 }
 0x37b   : > { %2499 = vrcp.f32 %v1019_v0 }
 0x37c   : > { %v2490_v31 = vpop.eup %2489  ;;  %v3555_v36 = vpop.xlane.xlu1 %1034 }
 0x37d   : > { %1479 = vadd.xlane.f32.xlu1 %v2488_v62  ;;  %1902 = vadd.xlane.f32.xlu0 %v2482_v34  ;;  %v2492_v43 = vpop.eup %2491  ;;  %v3544_v34 = vpop.f32.mrf.mxu3 }
 0x37e   : > { %v1025_v52 = vpop.xlane.xlu0 %1024  ;;  %v2494_v55 = vpop.eup %2493  ;;  %v1922_v50 = vpack.c.bf16 %v2490_v31, %v2492_v43 }
 0x37f   : > { %1551 = vmatmul.bf16.gmra.mxu3 %v1487_v12  ;;  %1981 = vmatmul.bf16.gmra.mxu2 %v1921_v21  ;;  %v2496_v42 = vpop.eup %2495 }
 0x380   : > { %v1923_v54 = vpack.c.bf16 %v2494_v55, %v2496_v42  ;;  %v2498_v35 = vpop.eup %2497 }
 0x381   : > { %v1021_v11 = vpop.xlane.xlu2 %1020  ;;  %v1144_v47 = vmul.f32 %v2498_v35, %v3435_v38 }
 0x382   : > { %1910 = vadd.xlane.f32.xlu2 %v2490_v31  ;;  %2501 = vrcp.f32 %v1021_v11 }
 0x385   : > { %1900 = vadd.xlane.f32.xlu1 %v2480_v20  ;;  %1908 = vadd.xlane.f32.xlu0 %v2492_v43 }
 0x386   : > { %v1031_v20 = vpop.xlane.xlu0 %1030 }
 0x389   : > { %v1027_v16 = vpop.xlane.xlu2 %1026 }
 0x38a   : > { %638 = vadd.xlane.f32.xlu2 %v3111_v39  ;;  %v3548_v39 = vpop.f32.mrf.mxu3  ;;  %2503 = vrcp.f32 %v1027_v16 }
 0x38b   : > { %2505 = vrcp.f32 %v3533_v57 }
 0x38c   : > { %2507 = vrcp.f32 %v1025_v52 }
 0x38d   : > { %1906 = vadd.xlane.f32.xlu1 %v2486_v13  ;;  %1914 = vadd.xlane.f32.xlu0 %v2494_v55 }
 0x38e   : > { %v1037_v46 = vpop.xlane.xlu0 %1036 }
 0x38f   : > { %1556 = vmatmul.bf16.gmra.mxu3 %v1488_v2  ;;  %1986 = vmatmul.bf16.gmra.mxu2 %v1922_v50 }
 0x391   : > { %v1033_v28 = vpop.xlane.xlu2 %1032 }
 0x392   : > { %644 = vadd.xlane.f32.xlu2 %v3132_v56  ;;  %v3553_v8 = vpop.f32.mrf.mxu3  ;;  %2509 = vrcp.f32 %v1033_v28 }
 0x393   : > { %2511 = vrcp.f32 %v1023_v32 }
 0x394   : > { %2513 = vrcp.f32 %v1031_v20 }
 0x395   : > { %1912 = vadd.xlane.f32.xlu1 %v2496_v42  ;;  %642 = vadd.xlane.f32.xlu0 %v3121_v18 }
 0x396   : > { %v3557_v49 = vpop.xlane.xlu0 %1042 }
 0x399   : > { %v1039_v58 = vpop.xlane.xlu2 %1038 }
 0x39a   : > { %650 = vadd.xlane.f32.xlu2 %v3150_v1  ;;  %v3562_v1 = vpop.f32.mrf.mxu3  ;;  %2515 = vrcp.f32 %v1039_v58 }
 0x39b   : > { %2517 = vrcp.f32 %v1029_v7 }
 0x39c   : > { %2519 = vrcp.f32 %v1037_v46 }
 0x39d   : > { %640 = vadd.xlane.f32.xlu1 %v3119_v51  ;;  %648 = vadd.xlane.f32.xlu0 %v3147_v40  ;;  %v3564_v51 = vpop.xlane.xlu1 %1040  ;;  %v2500_v40 = vpop.eup %2499 }
 0x39e   : > { %v3566_v29 = vpop.xlane.xlu0 %1451  ;;  %v1145_v44 = vmul.f32 %v2500_v40, %v3442_v61  ;;  %v2502_v24 = vpop.eup %2501 }
 0x39f   : > { %1991 = vmatmul.bf16.vlgmr.msra.gmra.mxu3 %v1923_v54  ;;  %v2504_v6 = vpop.eup %2503  ;;  %v1146_v38 = vmul.f32 %v2502_v24, %v3454_v9  ;;  %v3586_v21 = vpop.f32.mrf.mxu2 }
 0x3a0   : > { %v1149_v13 = vmul.f32 %v2504_v6, %v3482_v41  ;;  %v2506_v62 = vpop.eup %2505 }
 0x3a1   : > { %v1045_v56 = vpop.xlane.xlu2 %1044  ;;  %v2508_v57 = vpop.eup %2507  ;;  %v1143_v0 = vmul.f32 %v2506_v62, %v3426_v59 }
 0x3a2   : > { %v3575_v4 = vpop.f32.mrf.mxu3  ;;  %v2510_v12 = vpop.eup %2509  ;;  %v1148_v41 = vmul.f32 %v2508_v57, %v3474_v48  ;;  %2521 = vrcp.f32 %v1045_v56 }
 0x3a3   : > { %v1152_v10 = vmul.f32 %v2510_v12, %v3504_v63  ;;  %v2512_v59 = vpop.eup %2511  ;;  %2523 = vrcp.f32 %v3555_v36 }
 0x3a4   : > { %v2514_v43 = vpop.eup %2513  ;;  %v1147_v3 = vmul.f32 %v2512_v59, %v3463_v5  ;;  %2525 = vrcp.f32 %v3557_v49 }
 0x3a5   : > { %646 = vadd.xlane.f32.xlu1 %v3136_v14  ;;  %v3577_v17 = vpop.xlane.xlu1 %1449  ;;  %v2516_v27 = vpop.eup %2515  ;;  %v1151_v16 = vmul.f32 %v2514_v43, %v3498_v53 }
 0x3a6   : > { %v3580_v61 = vpop.xlane.xlu0 %1457  ;;  %v1155_v55 = vmul.f32 %v2516_v27, %v3528_v23  ;;  %v2518_v2 = vpop.eup %2517 }
 0x3a7   : > { %v1959_v48 = vpop.f32.mrf.mxu2  ;;  %v2520_v50 = vpop.eup %2519  ;;  %v1150_v32 = vmul.f32 %v2518_v2, %v3487_v30 }
 0x3a8   : > { %v2522_v20 = vpop.eup %2521  ;;  %v1154_v28 = vmul.f32 %v2520_v50, %v3520_v26 }
 0x3a9   : > { %v3560_v18 = vpop.xlane.xlu2 %1453  ;;  %v1158_v58 = vmul.f32 %v2522_v20, %v3544_v34  ;;  %v2524_v30 = vpop.eup %2523 }
 0x3aa   : > { %v3591_v9 = vpop.f32.mrf.mxu3  ;;  %v2526_v54 = vpop.eup %2525  ;;  %v1153_v36 = vmul.f32 %v2524_v30, %v3513_v19 }
 0x3ab   : > { %v1157_v34 = vmul.f32 %v2526_v54, %v3539_v33 }
 0x3ad   : > { %v3594_v31 = vpop.xlane.xlu1 %1455 }
 0x3b1   : > { %1177 = vrot.lane.b32.xlu0 %v1144_v47, %s2634_s29  ;;  %v3573_v14 = vpop.xlane.xlu2 %1459 }
 0x3b2   : > { %1179 = vrot.lane.b32.xlu2 %v1145_v44, %s2634_s29  ;;  %v1534_v5 = vpop.f32.mrf.mxu3 }
 0x3b5   : > { %v3606_v63 = vpop.xlane.xlu1 %1461 }
 0x3b7   : > { %v3618_v23 = vpop.f32.mrf.mxu2 }
 0x3b9   : > { %1181 = vrot.lane.b32.xlu0 %v1146_v38, %s2634_s29  ;;  %v3588_v22 = vpop.xlane.xlu2 %1465 }
 0x3ba   : > { %1187 = vrot.lane.b32.xlu2 %v1149_v13, %s2634_s29 }
 0x3bd   : > { %v3621_v42 = vpop.xlane.xlu1 %1467 }
 0x3be   : > { %1175 = vrot.lane.b32.xlu1 %v1143_v0, %s2634_s29 }
 0x3bf   : > { %v3645_v47 = vpop.f32.mrf.mxu2 }
 0x3c0   : > { %v3596_v11 = vpop.xlane.xlu0 %1463 }
 0x3c1   : > { %1185 = vrot.lane.b32.xlu0 %v1148_v41, %s2634_s29 }
 0x3c2   : > { %1193 = vrot.lane.b32.xlu2 %v1152_v10, %s2634_s29 }
 0x3c5   : > { %v3602_v52 = vpop.xlane.xlu2 %1471 }
 0x3c6   : > { %1183 = vrot.lane.b32.xlu1 %v1147_v3, %s2634_s29 }
 0x3c8   : > { %v3608_v25 = vpop.xlane.xlu0 %1469 }
 0x3c9   : > { %1191 = vrot.lane.b32.xlu0 %v1151_v16, %s2634_s29 }
 0x3ca   : > { %1199 = vrot.lane.b32.xlu2 %v1155_v55, %s2634_s29 }
 0x3cd   : > { %v1887_v53 = vpop.xlane.xlu2 %1886 }
 0x3ce   : > { %2527 = vrcp.f32 %v1887_v53  ;;  %1189 = vrot.lane.b32.xlu1 %v1150_v32, %s2634_s29 }
 0x3cf   : > { %2529 = vrcp.f32 %v3560_v18 }
 0x3d0   : > { %v3623_v7 = vpop.xlane.xlu0 %1475  ;;  %2531 = vrcp.f32 %v3564_v51 }
 0x3d1   : > { %1197 = vrot.lane.b32.xlu0 %v1154_v28, %s2634_s29  ;;  %2533 = vrcp.f32 %v3566_v29 }
 0x3d2   : > { %v3627_v46 = vpop.f32.mrf.mxu3  ;;  %1205 = vrot.lane.b32.xlu2 %v1158_v58, %s2634_s29  ;;  %2535 = vrcp.f32 %v3573_v14 }
 0x3d3   : > { %2537 = vrcp.f32 %v3577_v17  ;;  %v3661_v17 = vpop.f32.mrf.mxu2 }
 0x3d4   : > { %v2528_v56 = vpop.eup %2527  ;;  %2539 = vrcp.f32 %v3580_v61 }
 0x3d5   : > { %v2530_v26 = vpop.eup %2529  ;;  %v3632_v49 = vpop.xlane.xlu2 %1477  ;;  %v3634_v18 = vmul.f32 %v2528_v56, %v1959_v48  ;;  %2541 = vrcp.f32 %v3588_v22 }
 0x3d6   : > { %1195 = vrot.lane.b32.xlu1 %v1153_v36, %s2634_s29  ;;  %v1580_v51 = vmul.f32 %v2530_v26, %v3562_v1  ;;  %v2532_v19 = vpop.eup %2531  ;;  %2543 = vrcp.f32 %v3594_v31 }
 0x3d7   : > { %v2534_v29 = vpop.eup %2533  ;;  %v1156_v33 = vmul.f32 %v2532_v19, %v3535_v37  ;;  %2545 = vrcp.f32 %v3596_v11 }
 0x3d8   : > { %v3640_v35 = vpop.xlane.xlu1 %1473  ;;  %v3642_v40 = vpop.xlane.xlu0 %1884  ;;  %v1579_v1 = vmul.f32 %v2534_v29, %v3553_v8  ;;  %2547 = vrcp.f32 %v3606_v63 }
 0x3d9   : > { %1203 = vrot.lane.b32.xlu0 %v1157_v34, %s2634_s29  ;;  %v2536_v14 = vpop.eup %2535  ;;  %2549 = vrcp.f32 %v3608_v25 }
 0x3da   : > { %v1539_v44 = vpop.f32.mrf.mxu3  ;;  %1614 = vrot.lane.b32.xlu2 %v1580_v51, %s2635_s30  ;;  %v1583_v13 = vmul.f32 %v2536_v14, %v1534_v5  ;;  %v2538_v62 = vpop.eup %2537  ;;  %2551 = vrcp.f32 %v3602_v52 }
 0x3db   : > { %v2540_v61 = vpop.eup %2539  ;;  %v1578_v8 = vmul.f32 %v2538_v62, %v3548_v39  ;;  %v3678_v39 = vpop.f32.mrf.mxu2  ;;  %2553 = vrcp.f32 %v3621_v42 }
 0x3dc   : > { %v2542_v0 = vpop.eup %2541  ;;  %v1582_v12 = vmul.f32 %v2540_v61, %v3591_v9  ;;  %2555 = vrcp.f32 %v3640_v35 }
 0x3dd   : > { %v3651_v24 = vpop.xlane.xlu2 %1892  ;;  %v2544_v59 = vpop.eup %2543 }
 0x3de   : > { %1201 = vrot.lane.b32.xlu1 %v1156_v33, %s2634_s29  ;;  %v1581_v43 = vmul.f32 %v2544_v59, %v3575_v4  ;;  %v2546_v11 = vpop.eup %2545 }
 0x3df   : > { %v1585_v3 = vmul.f32 %v2546_v11, %v1539_v44  ;;  %v2548_v55 = vpop.eup %2547 }
 0x3e0   : > { %v3656_v6 = vpop.xlane.xlu1 %1888  ;;  %v3658_v38 = vpop.xlane.xlu0 %1890  ;;  %v1584_v4 = vmul.f32 %v2548_v55, %v3627_v46  ;;  %v3886_v55 = vld [vmem:[#allocation5_spill] sm:$0xff] }
 0x3e1   : > { %1612 = vrot.lane.b32.xlu0 %v1579_v1, %s2635_s30  ;;  %v2550_v5 = vpop.eup %2549 }
 0x3e2   : > { %v1542_v37 = vpop.f32.mrf.mxu3  ;;  %1620 = vrot.lane.b32.xlu2 %v1583_v13, %s2635_s30  ;;  %v2552_v20 = vpop.eup %2551 }
 0x3e3   : > { %v1586_v22 = vmul.f32 %v2542_v0, %v1542_v37  ;;  %v3691_v2 = vpop.f32.mrf.mxu2  ;;  %v2554_v28 = vpop.eup %2553 }
 0x3e4   : > { %v2556_v56 = vpop.eup %2555 }
 0x3e5   : > { %v3667_v57 = vpop.xlane.xlu2 %1898 }
 0x3e6   : > { %1610 = vrot.lane.b32.xlu1 %v1578_v8, %s2635_s30 }
 0x3e8   : > { %v3672_v41 = vpop.xlane.xlu1 %1894  ;;  %v3674_v10 = vpop.xlane.xlu0 %1896 }
 0x3e9   : > { %1618 = vrot.lane.b32.xlu0 %v1582_v12, %s2635_s30 }
 0x3ea   : > { %v1544_v31 = vpop.f32.mrf.mxu3  ;;  %1626 = vrot.lane.b32.xlu2 %v1586_v22, %s2635_s30 }
 0x3eb   : > { %v1587_v58 = vmul.f32 %v2554_v28, %v1544_v31  ;;  %v3705_v42 = vpop.f32.mrf.mxu2  ;;  %v3884_v31 = vld [vmem:[#allocation6_spill] sm:$0xff] }
 0x3ed   : > { %v3682_v9 = vpop.xlane.xlu2 %1904 }
 0x3ee   : > { %1616 = vrot.lane.b32.xlu1 %v1581_v43, %s2635_s30 }
 0x3f0   : > { %v3686_v27 = vpop.xlane.xlu1 %1479  ;;  %v3688_v48 = vpop.xlane.xlu0 %1902 }
 0x3f1   : > { %1624 = vrot.lane.b32.xlu0 %v1585_v3, %s2635_s30 }
 0x3f2   : > { %v1547_v16 = vpop.f32.mrf.mxu3 }
 0x3f3   : > { %v1588_v25 = vmul.f32 %v2550_v5, %v1547_v16  ;;  %v3716_v19 = vpop.f32.mrf.mxu2  ;;  %v3885_v16 = vld [vmem:[#allocation3_spill] sm:$0xff] }
 0x3f5   : > { %v3696_v63 = vpop.xlane.xlu2 %1910 }
 0x3f6   : > { %1622 = vrot.lane.b32.xlu1 %v1584_v4, %s2635_s30 }
 0x3f8   : > { %v3699_v50 = vpop.xlane.xlu1 %1900  ;;  %v3701_v32 = vpop.xlane.xlu0 %1908 }
 0x3f9   : > { %1630 = vrot.lane.b32.xlu0 %v1588_v25, %s2635_s30 }
 0x3fa   : > { %v1549_v53 = vpop.f32.mrf.mxu3 }
 0x3fb   : > { %v1589_v52 = vmul.f32 %v2552_v20, %v1549_v53  ;;  %v3727_v8 = vpop.f32.mrf.mxu2 }
 0x3fd   : > { %1632 = vrot.lane.b32.xlu2 %v1589_v52, %s2635_s30  ;;  %v639_v30 = vpop.xlane.xlu2 %638 }
 0x3fe   : > { %2557 = vrcp.f32 %v639_v30  ;;  %1628 = vrot.lane.b32.xlu1 %v1587_v58, %s2635_s30 }
 0x3ff   : > { %2559 = vrcp.f32 %v3623_v7 }
 0x400   : > { %v3709_v46 = vpop.xlane.xlu1 %1906  ;;  %v3711_v54 = vpop.xlane.xlu0 %1914 }
 0x402   : > { %v1552_v36 = vpop.f32.mrf.mxu3 }
 0x403   : > { %v1590_v26 = vmul.f32 %v2556_v56, %v1552_v36  ;;  %v1982_v20 = vpop.f32.mrf.mxu2 }
 0x404   : > { %v2558_v34 = vpop.eup %2557 }
 0x405   : > { %v645_v35 = vpop.xlane.xlu2 %644  ;;  %v782_v51 = vmul.f32 %v2558_v34, %v3238_v45  ;;  %v2560_v33 = vpop.eup %2559 }
 0x406   : > { %2561 = vrcp.f32 %v645_v35  ;;  %1634 = vrot.lane.b32.xlu1 %v1590_v26, %s2635_s30 }
 0x407   : > { %798 = vst.msk [vmem:[#allocation2 + $0x48] sm:$0xff] %vm442_vm0, %v782_v51  ;;  %2563 = vrcp.f32 %v3642_v40 }
 0x408   : > { %v3719_v44 = vpop.xlane.xlu1 %1912  ;;  %v643_v29 = vpop.xlane.xlu0 %642 }
 0x409   : > { %2565 = vrcp.f32 %v643_v29 }
 0x40a   : > { %v1554_v14 = vpop.f32.mrf.mxu3  ;;  %2567 = vrcp.f32 %v3632_v49 }
 0x40b   : > { %v1591_v1 = vmul.f32 %v2560_v33, %v1554_v14  ;;  %v1984_v34 = vpop.f32.mrf.mxu2 }
 0x40c   : > { %v2562_v7 = vpop.eup %2561 }
 0x40d   : > { %1636 = vrot.lane.b32.xlu0 %v1591_v1, %s2635_s30  ;;  %v651_v45 = vpop.xlane.xlu2 %650  ;;  %v785_v13 = vmul.f32 %v2562_v7, %v3254_v60  ;;  %v2564_v62 = vpop.eup %2563 }
 0x40e   : > { %2569 = vrcp.f32 %v651_v45  ;;  %v2013_v60 = vmul.f32 %v2564_v62, %v3586_v21 }
 0x40f   : > { %801 = vst.msk [vmem:[#allocation2 + $0x60] sm:$0xff] %vm442_vm0, %v785_v13  ;;  %v2566_v37 = vpop.eup %2565  ;;  %2571 = vrcp.f32 %v3658_v38 }
 0x410   : > { %v641_v40 = vpop.xlane.xlu1 %640  ;;  %v649_v61 = vpop.xlane.xlu0 %648  ;;  %v784_v0 = vmul.f32 %v2566_v37, %v3250_v15 }
 0x411   : > { %2573 = vrcp.f32 %v641_v40  ;;  %v2568_v49 = vpop.eup %2567 }
 0x412   : > { %2575 = vrcp.f32 %v649_v61  ;;  %v1557_v12 = vpop.f32.mrf.mxu3  ;;  %800 = vst.msk [vmem:[#allocation2 + $0x58] sm:$0xff] %vm442_vm0, %v784_v0 }
 0x413   : > { %v1592_v22 = vmul.f32 %v2568_v49, %v1557_v12  ;;  %2577 = vrcp.f32 %v3686_v27 }
 0x414   : > { %v2570_v59 = vpop.eup %2569  ;;  %2579 = vrcp.f32 %v3656_v6 }
 0x415   : > { %2045 = vrot.lane.b32.xlu0 %v2013_v60, %s2636_s4  ;;  %1638 = vrot.lane.b32.xlu2 %v1592_v22, %s2635_s30  ;;  %v1180_v38 = vpop.permute.xlu2 %1179  ;;  %v788_v15 = vmul.f32 %v2570_v59, %v3884_v31  ;;  %v2572_v43 = vpop.eup %2571 }
 0x416   : > { %1226 = vst.msk [vmem:[#allocation2 + $0x10] sm:$0xff] %vm1223_vm1, %v1180_v38  ;;  %v2016_v28 = vmul.f32 %v2572_v43, %v3645_v47 }
 0x417   : > { %v2574_v11 = vpop.eup %2573  ;;  %804 = vst.msk [vmem:[#allocation2 + $0x78] sm:$0xff] %vm442_vm0, %v788_v15 }
 0x418   : > { %v2576_v21 = vpop.eup %2575  ;;  %v647_v3 = vpop.xlane.xlu1 %646  ;;  %v783_v27 = vmul.f32 %v2574_v11, %v3885_v16 }
 0x419   : > { %2581 = vrcp.f32 %v647_v3  ;;  %v787_v4 = vmul.f32 %v2576_v21, %v3886_v55  ;;  %v2578_v5 = vpop.eup %2577 }
 0x41a   : > { %2583 = vrcp.f32 %v3674_v10  ;;  %v1559_v25 = vpop.f32.mrf.mxu3  ;;  %799 = vst.msk [vmem:[#allocation2 + $0x50] sm:$0xff] %vm442_vm0, %v783_v27  ;;  %v2580_v52 = vpop.eup %2579 }
 0x41b   : > { %2585 = vrcp.f32 %v3651_v24  ;;  %v1593_v53 = vmul.f32 %v2578_v5, %v1559_v25  ;;  %803 = vst.msk [vmem:[#allocation2 + $0x70] sm:$0xff] %vm442_vm0, %v787_v4  ;;  %v3887_v24 = vld [vmem:[#allocation4_spill] sm:$0xff]  ;;  %v2015_v36 = vmul.f32 %v2580_v52, %v3618_v23 }
 0x41c   : > { %2587 = vrcp.f32 %v3672_v41 }
 0x41d   : > { %1640 = vrot.lane.b32.xlu1 %v1593_v53, %s2635_s30  ;;  %2051 = vrot.lane.b32.xlu0 %v2016_v28, %s2636_s4  ;;  %v1188_v6 = vpop.permute.xlu2 %1187  ;;  %2589 = vrcp.f32 %v3667_v57 }
 0x41e   : > { %2047 = vrot.lane.b32.xlu2 %v3634_v18, %s2636_s4  ;;  %1230 = vst.msk [vmem:[#allocation2 + $0x30] sm:$0xff] %vm1223_vm1, %v1188_v6  ;;  %2591 = vrcp.f32 %v3688_v48 }
 0x41f   : > { %v2582_v10 = vpop.eup %2581  ;;  %2593 = vrcp.f32 %v3699_v50  ;;  %v1987_v50 = vpop.f32.mrf.mxu2 }
 0x420   : > { %v2584_v58 = vpop.eup %2583  ;;  %v786_v30 = vmul.f32 %v2582_v10, %v3887_v24  ;;  %2595 = vrcp.f32 %v3701_v32 }
 0x421   : > { %v2586_v56 = vpop.eup %2585  ;;  %v2019_v26 = vmul.f32 %v2584_v58, %v3691_v2  ;;  %2597 = vrcp.f32 %v3682_v9 }
 0x422   : > { %802 = vst.msk [vmem:[#allocation2 + $0x68] sm:$0xff] %vm442_vm0, %v786_v30  ;;  %v2017_v18 = vmul.f32 %v2586_v56, %v3661_v17  ;;  %v2588_v57 = vpop.eup %2587  ;;  %v1992_v33 = vpop.f32.mrf.mxu3  ;;  %2599 = vrcp.f32 %v3709_v46 }
 0x423   : > { %v1178_v47 = vpop.permute.xlu0 %1177  ;;  %v2590_v23 = vpop.eup %2589  ;;  %v2018_v17 = vmul.f32 %v2588_v57, %v3678_v39  ;;  %2601 = vrcp.f32 %v3711_v54 }
 0x424   : > { %1225 = vst.msk [vmem:[#allocation2 + $0x8] sm:$0xff] %vm1223_vm1, %v1178_v47  ;;  %v2592_v35 = vpop.eup %2591  ;;  %v2020_v51 = vmul.f32 %v2590_v23, %v3705_v42  ;;  %2603 = vrcp.f32 %v3696_v63 }
 0x425   : > { %2049 = vrot.lane.b32.xlu1 %v2015_v36, %s2636_s4  ;;  %2057 = vrot.lane.b32.xlu0 %v2019_v26, %s2636_s4  ;;  %v1194_v41 = vpop.permute.xlu2 %1193  ;;  %v2022_v48 = vmul.f32 %v2592_v35, %v3727_v8  ;;  %v2594_v39 = vpop.eup %2593  ;;  %2605 = vrcp.f32 %v3719_v44 }
 0x426   : > { %2053 = vrot.lane.b32.xlu2 %v2017_v18, %s2636_s4  ;;  %1233 = vst.msk [vmem:[#allocation2 + $0x48] sm:$0xff] %vm1223_vm1, %v1194_v41  ;;  %v2596_v32 = vpop.eup %2595  ;;  %v2021_v7 = vmul.f32 %v2594_v39, %v3716_v19 }
 0x427   : > { %v2598_v42 = vpop.eup %2597  ;;  %v2025_v9 = vmul.f32 %v2596_v32, %v1987_v50  ;;  %v1989_v19 = vpop.f32.mrf.mxu2 }
 0x428   : > { %v2023_v45 = vmul.f32 %v2598_v42, %v1982_v20  ;;  %v2600_v37 = vpop.eup %2599 }
 0x429   : > { %v2602_v54 = vpop.eup %2601  ;;  %v2024_v61 = vmul.f32 %v2600_v37, %v1984_v34 }
 0x42a   : > { %v1994_v46 = vpop.f32.mrf.mxu3  ;;  %v2604_v40 = vpop.eup %2603 }
 0x42b   : > { %v1182_v2 = vpop.permute.xlu0 %1181  ;;  %v2028_v8 = vmul.f32 %v2602_v54, %v1994_v46  ;;  %v2026_v0 = vmul.f32 %v2604_v40, %v1989_v19  ;;  %v2606_v22 = vpop.eup %2605 }
 0x42c   : > { %1227 = vst.msk [vmem:[#allocation2 + $0x18] sm:$0xff] %vm1223_vm1, %v1182_v2  ;;  %v2027_v60 = vmul.f32 %v2606_v22, %v1992_v33 }
 0x42d   : > { %2055 = vrot.lane.b32.xlu1 %v2018_v17, %s2636_s4  ;;  %2063 = vrot.lane.b32.xlu0 %v2022_v48, %s2636_s4  ;;  %v1200_v29 = vpop.permute.xlu2 %1199 }
 0x42e   : > { %2059 = vrot.lane.b32.xlu2 %v2020_v51, %s2636_s4  ;;  %1236 = vst.msk [vmem:[#allocation2 + $0x60] sm:$0xff] %vm1223_vm1, %v1200_v29 }
 0x430   : > { %v1176_v14 = vpop.permute.xlu1 %1175 }
 0x431   : > { %1224 = vst.msk [vmem:[#allocation2] sm:$0xff] %vm1223_vm1, %v1176_v14 }
 0x433   : > { %v1186_v1 = vpop.permute.xlu0 %1185 }
 0x434   : > { %1229 = vst.msk [vmem:[#allocation2 + $0x28] sm:$0xff] %vm1223_vm1, %v1186_v1 }
 0x435   : > { %2061 = vrot.lane.b32.xlu1 %v2021_v7, %s2636_s4  ;;  %2069 = vrot.lane.b32.xlu0 %v2025_v9, %s2636_s4  ;;  %v1206_v13 = vpop.permute.xlu2 %1205 }
 0x436   : > { %2065 = vrot.lane.b32.xlu2 %v2023_v45, %s2636_s4  ;;  %1239 = vst.msk [vmem:[#allocation2 + $0x78] sm:$0xff] %vm1223_vm1, %v1206_v13 }
 0x438   : > { %v1184_v62 = vpop.permute.xlu1 %1183 }
 0x439   : > { %1228 = vst.msk [vmem:[#allocation2 + $0x20] sm:$0xff] %vm1223_vm1, %v1184_v62 }
 0x43b   : > { %v1192_v63 = vpop.permute.xlu0 %1191 }
 0x43c   : > { %1232 = vst.msk [vmem:[#allocation2 + $0x40] sm:$0xff] %vm1223_vm1, %v1192_v63 }
 0x43d   : > { %2067 = vrot.lane.b32.xlu1 %v2024_v61, %s2636_s4  ;;  %2075 = vrot.lane.b32.xlu0 %v2028_v8, %s2636_s4  ;;  %v1615_v49 = vpop.permute.xlu2 %1614 }
 0x43e   : > { %2071 = vrot.lane.b32.xlu2 %v2026_v0, %s2636_s4  ;;  %1661 = vst.msk [vmem:[#allocation2 + $0x10] sm:$0xff] %vm1658_vm2, %v1615_v49 }
 0x440   : > { %v1190_v12 = vpop.permute.xlu1 %1189 }
 0x441   : > { %1231 = vst.msk [vmem:[#allocation2 + $0x38] sm:$0xff] %vm1223_vm1, %v1190_v12 }
 0x443   : > { %v1198_v59 = vpop.permute.xlu0 %1197 }
 0x444   : > { %1235 = vst.msk [vmem:[#allocation2 + $0x58] sm:$0xff] %vm1223_vm1, %v1198_v59 }
 0x445   : > { %2073 = vrot.lane.b32.xlu1 %v2027_v60, %s2636_s4  ;;  %v1621_v44 = vpop.permute.xlu2 %1620 }
 0x446   : > { %1664 = vst.msk [vmem:[#allocation2 + $0x28] sm:$0xff] %vm1658_vm2, %v1621_v44 }
 0x448   : > { %v1196_v38 = vpop.permute.xlu1 %1195 }
 0x449   : > { %1234 = vst.msk [vmem:[#allocation2 + $0x50] sm:$0xff] %vm1223_vm1, %v1196_v38 }
 0x44b   : > { %v1204_v31 = vpop.permute.xlu0 %1203 }
 0x44c   : > { %1238 = vst.msk [vmem:[#allocation2 + $0x70] sm:$0xff] %vm1223_vm1, %v1204_v31 }
 0x44d   : > { %v1627_v15 = vpop.permute.xlu2 %1626 }
 0x44e   : > { %1667 = vst.msk [vmem:[#allocation2 + $0x40] sm:$0xff] %vm1658_vm2, %v1627_v15 }
 0x450   : > { %v1202_v43 = vpop.permute.xlu1 %1201 }
 0x451   : > { %1237 = vst.msk [vmem:[#allocation2 + $0x68] sm:$0xff] %vm1223_vm1, %v1202_v43 }
 0x453   : > { %v1613_v11 = vpop.permute.xlu0 %1612 }
 0x454   : > { %1660 = vst.msk [vmem:[#allocation2 + $0x8] sm:$0xff] %vm1658_vm2, %v1613_v11 }
 0x457   : > { %v1633_v21 = vpop.permute.xlu2 %1632 }
 0x458   : > { %1670 = vst.msk [vmem:[#allocation2 + $0x58] sm:$0xff] %vm1658_vm2, %v1633_v21  ;;  %v1611_v3 = vpop.permute.xlu1 %1610 }
 0x459   : > { %1659 = vst.msk [vmem:[#allocation2] sm:$0xff] %vm1658_vm2, %v1611_v3 }
 0x45b   : > { %v1619_v16 = vpop.permute.xlu0 %1618 }
 0x45c   : > { %1663 = vst.msk [vmem:[#allocation2 + $0x20] sm:$0xff] %vm1658_vm2, %v1619_v16 }
 0x460   : > { %v1617_v27 = vpop.permute.xlu1 %1616 }
 0x461   : > { %1662 = vst.msk [vmem:[#allocation2 + $0x18] sm:$0xff] %vm1658_vm2, %v1617_v27 }
 0x463   : > { %v1625_v55 = vpop.permute.xlu0 %1624 }
 0x464   : > { %1666 = vst.msk [vmem:[#allocation2 + $0x38] sm:$0xff] %vm1658_vm2, %v1625_v55 }
 0x468   : > { %v1623_v4 = vpop.permute.xlu1 %1622 }
 0x469   : > { %1665 = vst.msk [vmem:[#allocation2 + $0x30] sm:$0xff] %vm1658_vm2, %v1623_v4 }
 0x46b   : > { %v1631_v5 = vpop.permute.xlu0 %1630 }
 0x46c   : > { %1669 = vst.msk [vmem:[#allocation2 + $0x50] sm:$0xff] %vm1658_vm2, %v1631_v5 }
 0x46f   : > { %v1639_v25 = vpop.permute.xlu2 %1638 }
 0x470   : > { %1673 = vst.msk [vmem:[#allocation2 + $0x70] sm:$0xff] %vm1658_vm2, %v1639_v25  ;;  %v1629_v20 = vpop.permute.xlu1 %1628 }
 0x471   : > { %1668 = vst.msk [vmem:[#allocation2 + $0x48] sm:$0xff] %vm1658_vm2, %v1629_v20 }
 0x478   : > { %v2048_v53 = vpop.permute.xlu2 %2047  ;;  %v1635_v28 = vpop.permute.xlu1 %1634 }
 0x479   : > { %2095 = vst.msk [vmem:[#allocation2 + $0x8] sm:$0xff] %vm2093_vm3, %v2048_v53 }
 0x47a   : > { %1671 = vst.msk [vmem:[#allocation2 + $0x60] sm:$0xff] %vm1658_vm2, %v1635_v28 }
 0x47f   : > { %v1637_v6 = vpop.permute.xlu0 %1636 }
 0x480   : > { %v2111_v52 = vld [vmem:[#allocation2 + $0x8] sm:$0xff]  ;;  %1672 = vst.msk [vmem:[#allocation2 + $0x68] sm:$0xff] %vm1658_vm2, %v1637_v6  ;;  %v2054_v10 = vpop.permute.xlu2 %2053 }
 0x481   : > { %2128 = vst.msk [vmem:[%s3816_s7 + $0x8] sm:$0xff] %vm2126_vm4, %v2111_v52 }
 0x482   : > { %2098 = vst.msk [vmem:[#allocation2 + $0x20] sm:$0xff] %vm2093_vm3, %v2054_v10 }
 0x487   : > { %v2046_v58 = vpop.permute.xlu0 %2045 }
 0x488   : > { %2094 = vst.msk [vmem:[#allocation2] sm:$0xff] %vm2093_vm3, %v2046_v58  ;;  %v2060_v24 = vpop.permute.xlu2 %2059 }
 0x489   : > { %v2114_v30 = vld [vmem:[#allocation2 + $0x20] sm:$0xff]  ;;  %2101 = vst.msk [vmem:[#allocation2 + $0x38] sm:$0xff] %vm2093_vm3, %v2060_v24 }
 0x48a   : > { %2131 = vst.msk [vmem:[%s3816_s7 + $0x20] sm:$0xff] %vm2126_vm4, %v2114_v30 }
 0x48f   : > { %v2110_v56 = vld [vmem:[#allocation2] sm:$0xff]  ;;  %v1641_v47 = vpop.permute.xlu1 %1640  ;;  %v2052_v36 = vpop.permute.xlu0 %2051 }
 0x490   : > { %2127 = vst.msk [vmem:[%s3816_s7] sm:$0xff] %vm2126_vm4, %v2110_v56  ;;  %v2117_v26 = vld [vmem:[#allocation2 + $0x38] sm:$0xff]  ;;  %v2066_v18 = vpop.permute.xlu2 %2065 }
 0x491   : > { %2134 = vst.msk [vmem:[%s3816_s7 + $0x38] sm:$0xff] %vm2126_vm4, %v2117_v26 }
 0x492   : > { %1674 = vst.msk [vmem:[#allocation2 + $0x78] sm:$0xff] %vm1658_vm2, %v1641_v47 }
 0x493   : > { %2097 = vst.msk [vmem:[#allocation2 + $0x18] sm:$0xff] %vm2093_vm3, %v2052_v36 }
 0x494   : > { %2104 = vst.msk [vmem:[#allocation2 + $0x50] sm:$0xff] %vm2093_vm3, %v2066_v18 }
 0x497   : > { %v2050_v34 = vpop.permute.xlu1 %2049  ;;  %v2058_v41 = vpop.permute.xlu0 %2057 }
 0x498   : > { %2096 = vst.msk [vmem:[#allocation2 + $0x10] sm:$0xff] %vm2093_vm3, %v2050_v34  ;;  %v2072_v57 = vpop.permute.xlu2 %2071 }
 0x499   : > { %2100 = vst.msk [vmem:[#allocation2 + $0x30] sm:$0xff] %vm2093_vm3, %v2058_v41 }
 0x49a   : > { %v2113_v23 = vld [vmem:[#allocation2 + $0x18] sm:$0xff]  ;;  %2107 = vst.msk [vmem:[#allocation2 + $0x68] sm:$0xff] %vm2093_vm3, %v2072_v57 }
 0x49b   : > { %2130 = vst.msk [vmem:[%s3816_s7 + $0x18] sm:$0xff] %vm2126_vm4, %v2113_v23  ;;  %v2120_v35 = vld [vmem:[#allocation2 + $0x50] sm:$0xff] }
 0x49c   : > { %2137 = vst.msk [vmem:[%s3816_s7 + $0x50] sm:$0xff] %vm2126_vm4, %v2120_v35 }
 0x49f   : > { %v2112_v48 = vld [vmem:[#allocation2 + $0x10] sm:$0xff]  ;;  %v2056_v2 = vpop.permute.xlu1 %2055  ;;  %v2064_v17 = vpop.permute.xlu0 %2063 }
 0x4a0   : > { %2129 = vst.msk [vmem:[%s3816_s7 + $0x10] sm:$0xff] %vm2126_vm4, %v2112_v48  ;;  %v2116_v51 = vld [vmem:[#allocation2 + $0x30] sm:$0xff] }
 0x4a1   : > { %2133 = vst.msk [vmem:[%s3816_s7 + $0x30] sm:$0xff] %vm2126_vm4, %v2116_v51  ;;  %v2123_v29 = vld [vmem:[#allocation2 + $0x68] sm:$0xff] }
 0x4a2   : > { %2140 = vst.msk [vmem:[%s3816_s7 + $0x68] sm:$0xff] %vm2126_vm4, %v2123_v29 }
 0x4a3   : > { %2099 = vst.msk [vmem:[#allocation2 + $0x28] sm:$0xff] %vm2093_vm3, %v2056_v2 }
 0x4a4   : > { %2103 = vst.msk [vmem:[#allocation2 + $0x48] sm:$0xff] %vm2093_vm3, %v2064_v17 }
 0x4a7   : > { %v2062_v33 = vpop.permute.xlu1 %2061  ;;  %v2070_v50 = vpop.permute.xlu0 %2069 }
 0x4a8   : > { %2102 = vst.msk [vmem:[#allocation2 + $0x40] sm:$0xff] %vm2093_vm3, %v2062_v33 }
 0x4a9   : > { %2106 = vst.msk [vmem:[#allocation2 + $0x60] sm:$0xff] %vm2093_vm3, %v2070_v50 }
 0x4aa   : > { %v2115_v39 = vld [vmem:[#allocation2 + $0x28] sm:$0xff] }
 0x4ab   : > { %2132 = vst.msk [vmem:[%s3816_s7 + $0x28] sm:$0xff] %vm2126_vm4, %v2115_v39  ;;  %v2119_v14 = vld [vmem:[#allocation2 + $0x48] sm:$0xff] }
 0x4ac   : > { %2136 = vst.msk [vmem:[%s3816_s7 + $0x48] sm:$0xff] %vm2126_vm4, %v2119_v14 }
 0x4af   : > { %v2118_v32 = vld [vmem:[#allocation2 + $0x40] sm:$0xff]  ;;  %v2068_v42 = vpop.permute.xlu1 %2067  ;;  %v2076_v1 = vpop.permute.xlu0 %2075 }
 0x4b0   : > { %2135 = vst.msk [vmem:[%s3816_s7 + $0x40] sm:$0xff] %vm2126_vm4, %v2118_v32  ;;  %v2122_v9 = vld [vmem:[#allocation2 + $0x60] sm:$0xff] }
 0x4b1   : > { %2139 = vst.msk [vmem:[%s3816_s7 + $0x60] sm:$0xff] %vm2126_vm4, %v2122_v9 }
 0x4b2   : > { %2105 = vst.msk [vmem:[#allocation2 + $0x58] sm:$0xff] %vm2093_vm3, %v2068_v42 }
 0x4b3   : > { %2109 = vst.msk [vmem:[#allocation2 + $0x78] sm:$0xff] %vm2093_vm3, %v2076_v1 }
 0x4b7   : > { %v2074_v7 = vpop.permute.xlu1 %2073 }
 0x4b8   : > { %2108 = vst.msk [vmem:[#allocation2 + $0x70] sm:$0xff] %vm2093_vm3, %v2074_v7 }
 0x4b9   : > { %v2121_v45 = vld [vmem:[#allocation2 + $0x58] sm:$0xff] }
 0x4ba   : > { %2138 = vst.msk [vmem:[%s3816_s7 + $0x58] sm:$0xff] %vm2126_vm4, %v2121_v45  ;;  %v2125_v13 = vld [vmem:[#allocation2 + $0x78] sm:$0xff] }
 0x4bb   : > { %2142 = vst.msk [vmem:[%s3816_s7 + $0x78] sm:$0xff] %vm2126_vm4, %v2125_v13 }
 0x4bf   : > { %v2124_v46 = vld [vmem:[#allocation2 + $0x70] sm:$0xff] }
 0x4c0   : > { %2141 = vst.msk [vmem:[%s3816_s7 + $0x70] sm:$0xff] %vm2126_vm4, %v2124_v46 }
 0x4c1 PF: > { %s13_s14 = sadd.s32 1, %s2629_s14   ;;  %s3888_s12 = smov %s2625_s13 }
 0x4c2   : > { %p10_p5 = scmp.ge.s32.totalorder %s13_s14, 4   ;;  %s3889_s13 = smov %s3891_s15 }
 0x4c4   :  { %12 = sbr.rel (!%p10_p5) target bundleno = 2 (0x2), region = 68 }

</bundles_post_ra>
